<compile_context>
chip_gen: v6e
topology: v6e:2x2x1
jax: 0.10.0
libtpu: 0.0.40
codegen_flags: <defaults>
</compile_context>

<pallas_src>
import functools

import jax
import jax.numpy as jnp
from jax import lax
from jax.experimental import pallas as pl
from jax.experimental.pallas import tpu as pltpu


def _tgv_inpaint_kernel(t11_ref, t12_ref, t21_ref, t22_ref, dc_ref, db_ref,
                        ui_ref, w1i_ref, w2i_ref,
                        u_out, w1_out, w2_out, *, its):
    # Anisotropic diffusion tensor rows T = [[T11, T12], [T21, T22]].
    T11 = t11_ref[...]
    T12 = t12_ref[...]
    T21 = t21_ref[...]
    T22 = t22_ref[...]
    conf = dc_ref[...]        # data-term confidence (>= 0), channel 0 only
    data = db_ref[...]        # observed values, channel 0 only

    u0 = ui_ref[...]          # primary variable
    w10 = w1i_ref[...]        # auxiliary vector field, x component
    w20 = w2i_ref[...]        # auxiliary vector field, y component

    Y, X = u0.shape

    # --- loop-invariant boundary masks (hoisted: JAX does not CSE these) ---
    colx = lax.broadcasted_iota(jnp.int32, (Y, X), 1)
    rowy = lax.broadcasted_iota(jnp.int32, (Y, X), 0)
    last_x = colx == X - 1
    first_x = colx == 0
    last_y = rowy == Y - 1
    first_y = rowy == 0

    def dxp(a):  # forward difference in x, Neumann boundary
        return jnp.where(last_x, 0.0, pltpu.roll(a, X - 1, 1) - a)

    def dyp(a):  # forward difference in y, Neumann boundary
        return jnp.where(last_y, 0.0, pltpu.roll(a, Y - 1, 0) - a)

    def dxm(a):  # (negative adjoint of dxp) = backward-difference divergence
        am = jnp.where(first_x, 0.0, pltpu.roll(a, 1, 1))
        ac = jnp.where(last_x, 0.0, a)
        return ac - am

    def dym(a):
        am = jnp.where(first_y, 0.0, pltpu.roll(a, 1, 0))
        ac = jnp.where(last_y, 0.0, a)
        return ac - am

    tau = jnp.float32(1.0 / (12.0 ** 0.5))
    sigma = jnp.float32(1.0 / (12.0 ** 0.5))
    half_sigma = jnp.float32(0.5) * sigma
    alpha0 = jnp.float32(2.0)          # alpha1 == 1.0 -> multiply elided below
    eps = jnp.float32(1e-20)

    # --- loop-invariant planes (hoisted out of the iteration loop) ---
    inv_d = 1.0 / (1.0 + tau * conf)       # data-proximal divide
    tcd = (tau * conf) * data
    sT11 = sigma * T11                      # sigma folded into T (p-update)
    sT12 = sigma * T12
    sT21 = sigma * T21
    sT22 = sigma * T22
    tT11 = tau * T11                        # tau folded into T^T (e-path)
    tT12 = tau * T12
    tT21 = tau * T21
    tT22 = tau * T22

    zeros = jnp.zeros_like(u0)
    init_state = (u0, w10, w20,             # primal
                  zeros, zeros,             # dual p
                  zeros, zeros, zeros,      # dual q (q11, q22, q12)
                  u0, w10, w20)             # previous primal (carried unchanged)

    def body(_, state):
        u, w1, w2, p1, p2, q11, q22, q12, up, w1p, w2p = state

        # --- over-relaxed primal, formed on the fly (NOT loop-carried) ---
        ub = 2.0 * u - up
        w1b = 2.0 * w1 - w1p
        w2b = 2.0 * w2 - w2p

        # --- dual update q <- proj_{|.|<=alpha0}(q + sigma * sym_grad(w)) ---
        # (computed first and its divergence consumed immediately to limit
        #  the number of simultaneously-live full-plane temporaries)
        q11n = q11 + sigma * dxp(w1b)
        q22n = q22 + sigma * dyp(w2b)
        q12n = q12 + half_sigma * (dyp(w1b) + dxp(w2b))
        qnorm2 = q11n * q11n + q22n * q22n + 2.0 * q12n * q12n
        qscale = jnp.minimum(1.0, alpha0 * lax.rsqrt(qnorm2 + eps))
        q11n = q11n * qscale
        q22n = q22n * qscale
        q12n = q12n * qscale
        w1_div = dxm(q11n) + dym(q12n)
        w2_div = dxm(q12n) + dym(q22n)

        # --- dual update p <- proj_{|.|<=1}(p + (sigma*T)(grad u - w)) ---
        g1 = dxp(ub) - w1b
        g2 = dyp(ub) - w2b
        p1n = p1 + sT11 * g1 + sT12 * g2
        p2n = p2 + sT21 * g1 + sT22 * g2
        pnorm2 = p1n * p1n + p2n * p2n
        pscale = jnp.minimum(1.0, lax.rsqrt(pnorm2 + eps))   # alpha1 == 1
        p1n = p1n * pscale
        p2n = p2n * pscale

        # --- primal update: u (gradient step + weighted data proximal) ---
        te1 = tT11 * p1n + tT21 * p2n       # = tau * (T^T p)_1
        te2 = tT12 * p1n + tT22 * p2n       # = tau * (T^T p)_2
        un = (u + dxm(te1) + dym(te2) + tcd) * inv_d

        # --- primal update: w ---
        w1n = w1 + te1 + tau * w1_div
        w2n = w2 + te2 + tau * w2_div

        # previous primal carried through unchanged for over-relaxation
        return (un, w1n, w2n, p1n, p2n, q11n, q22n, q12n, u, w1, w2)

    state = lax.fori_loop(0, its, body, init_state, unroll=1)
    u_out[...] = state[0]
    w1_out[...] = state[1]
    w2_out[...] = state[2]


def _vmem_limit_bytes(Y, X):
    # Conservative live-plane estimate: 11 carried planes + ~14 invariants
    # (inv_d, tcd, sigma*T, tau*T, boundary masks) + 12 input/output planes
    # + body temporaries and double-buffering slack -> ~80 f32 planes.
    plane = Y * X * 4
    est = 80 * plane
    try:
        cap = pltpu.get_tpu_info().vmem_capacity_bytes
    except Exception:  # conservative fallback if hardware query unavailable
        cap = 64 << 20
    headroom = 12 << 20  # leave Mosaic internal scratch / IO buffers room
    return int(max(32 << 20, min(est, cap - headroom)))


@functools.partial(jax.jit, static_argnames=("its", "pid"))
def tgv_inpaint(t_dx, t_dy, t_dc, t_db, t_di, its, pid=3):
    """Mirrors TGVInpaint.forward: (Y,X,C) inputs -> (Y,X,3) solution."""
    Yx, Xx, Lx = t_dx.shape
    assert Lx == 2, "tensors should have 2 channels"
    Yi, Xi, Li = t_di.shape
    assert Li == 3, "input should have 3 channels (primary + two auxiliary)"
    del pid  # TODO(synk): pid (problem id) has no observable effect we can model.

    f32 = jnp.float32
    # Channel slices only (no (Y,X,C)->(C,Y,X) transposes); channel 1 of
    # dc/db is never read by the solver so it is never DMA'd.
    t11 = t_dx[..., 0].astype(f32)
    t12 = t_dx[..., 1].astype(f32)
    t21 = t_dy[..., 0].astype(f32)
    t22 = t_dy[..., 1].astype(f32)
    dc0 = t_dc[..., 0].astype(f32)
    db0 = t_db[..., 0].astype(f32)
    u0 = t_di[..., 0].astype(f32)
    w10 = t_di[..., 1].astype(f32)
    w20 = t_di[..., 2].astype(f32)

    kernel = functools.partial(_tgv_inpaint_kernel, its=int(its))
    vmem_spec = pl.BlockSpec(memory_space=pltpu.MemorySpace.VMEM)
    plane = jax.ShapeDtypeStruct((Yi, Xi), f32)
    cost = pl.CostEstimate(
        flops=int(its) * Yi * Xi * 90,
        transcendentals=int(its) * Yi * Xi * 2,
        bytes_accessed=12 * Yi * Xi * 4,
    )
    u_s, w1_s, w2_s = pl.pallas_call(
        kernel,
        out_shape=(plane, plane, plane),
        in_specs=[vmem_spec] * 9,
        out_specs=(vmem_spec, vmem_spec, vmem_spec),
        input_output_aliases={6: 0, 7: 1, 8: 2},   # di channels -> solution
        compiler_params=pltpu.CompilerParams(
            vmem_limit_bytes=_vmem_limit_bytes(Yi, Xi)),
        cost_estimate=cost,
    )(t11, t12, t21, t22, dc0, db0, u0, w10, w20)
    # TODO(synk): for images that no longer fit whole-image-in-VMEM
    # (~384^2 on v7x's 64 MiB, ~768^2 on v5e/v6e's 128 MiB), tile inside this
    # single pallas_call with Y-strips + per-iteration halo DMA (or a
    # pl.core_map 2-TC split) rather than re-launching per iteration, which
    # would make the kernel HBM-bound.

    # Pack to the module-facing (Y, X, 3) layout.
    return jnp.stack([u_s, w1_s, w2_s], axis=-1)


if __name__ == "__main__":
    key = jax.random.PRNGKey(0)
    # Lane-dense layout: X multiple of 128 (and > 128 to exercise multi-vreg
    # lane rolls), Y multiple of 8.
    Y, X = 16, 256
    k1, k2, k3, k4, k5 = jax.random.split(key, 5)

    # Anisotropic tensor rows (close to identity with small off-diagonals).
    t_dx = jnp.stack(
        [1.0 + 0.1 * jax.random.normal(k1, (Y, X)),
         0.05 * jax.random.normal(k2, (Y, X))], axis=-1).astype(jnp.float32)
    t_dy = jnp.stack(
        [0.05 * jax.random.normal(k2, (Y, X)),
         1.0 + 0.1 * jax.random.normal(k3, (Y, X))], axis=-1).astype(jnp.float32)
    # Confidence (sparse, nonnegative) and observed data.
    mask = (jax.random.uniform(k4, (Y, X)) > 0.7).astype(jnp.float32)
    t_dc = jnp.stack([10.0 * mask, jnp.zeros((Y, X))], axis=-1).astype(jnp.float32)
    obs = jax.random.uniform(k5, (Y, X))
    t_db = jnp.stack([obs, jnp.zeros((Y, X))], axis=-1).astype(jnp.float32)
    # Initial (u, w1, w2).
    t_di = jnp.stack([obs * mask, jnp.zeros((Y, X)), jnp.zeros((Y, X))],
                     axis=-1).astype(jnp.float32)

    sol = tgv_inpaint(t_dx, t_dy, t_dc, t_db, t_di, its=8, pid=3)
    sol = jax.block_until_ready(sol)
    assert sol.shape == (Y, X, 3) and sol.dtype == jnp.float32
    assert bool(jnp.all(jnp.isfinite(sol)))
    print("KERNEL_OK")
</pallas_src>

<mosaic_0001>
module attributes {stable_mosaic.version = 11 : i64} {
  func.func @_tgv_inpaint_kernel(%arg0: memref<16x256xf32, #tpu.memory_space<vmem>>, %arg1: memref<16x256xf32, #tpu.memory_space<vmem>>, %arg2: memref<16x256xf32, #tpu.memory_space<vmem>>, %arg3: memref<16x256xf32, #tpu.memory_space<vmem>>, %arg4: memref<16x256xf32, #tpu.memory_space<vmem>>, %arg5: memref<16x256xf32, #tpu.memory_space<vmem>>, %arg6: memref<16x256xf32, #tpu.memory_space<vmem>>, %arg7: memref<16x256xf32, #tpu.memory_space<vmem>>, %arg8: memref<16x256xf32, #tpu.memory_space<vmem>>, %arg9: memref<16x256xf32, #tpu.memory_space<vmem>>, %arg10: memref<16x256xf32, #tpu.memory_space<vmem>>, %arg11: memref<16x256xf32, #tpu.memory_space<vmem>>) attributes {dimension_semantics = [], scalar_prefetch = 0 : i64, scratch_operands = 0 : i64, tpu.core_type = #tpu.core_type<tc>} {
    %c0 = arith.constant 0 : index
    %c0_0 = arith.constant 0 : index
    %0 = vector.load %arg0[%c0, %c0_0] : memref<16x256xf32, #tpu.memory_space<vmem>>, vector<16x256xf32>
    %c0_1 = arith.constant 0 : index
    %c0_2 = arith.constant 0 : index
    %1 = vector.load %arg1[%c0_1, %c0_2] : memref<16x256xf32, #tpu.memory_space<vmem>>, vector<16x256xf32>
    %c0_3 = arith.constant 0 : index
    %c0_4 = arith.constant 0 : index
    %2 = vector.load %arg2[%c0_3, %c0_4] : memref<16x256xf32, #tpu.memory_space<vmem>>, vector<16x256xf32>
    %c0_5 = arith.constant 0 : index
    %c0_6 = arith.constant 0 : index
    %3 = vector.load %arg3[%c0_5, %c0_6] : memref<16x256xf32, #tpu.memory_space<vmem>>, vector<16x256xf32>
    %c0_7 = arith.constant 0 : index
    %c0_8 = arith.constant 0 : index
    %4 = vector.load %arg4[%c0_7, %c0_8] : memref<16x256xf32, #tpu.memory_space<vmem>>, vector<16x256xf32>
    %c0_9 = arith.constant 0 : index
    %c0_10 = arith.constant 0 : index
    %5 = vector.load %arg5[%c0_9, %c0_10] : memref<16x256xf32, #tpu.memory_space<vmem>>, vector<16x256xf32>
    %c0_11 = arith.constant 0 : index
    %c0_12 = arith.constant 0 : index
    %6 = vector.load %arg6[%c0_11, %c0_12] : memref<16x256xf32, #tpu.memory_space<vmem>>, vector<16x256xf32>
    %c0_13 = arith.constant 0 : index
    %c0_14 = arith.constant 0 : index
    %7 = vector.load %arg7[%c0_13, %c0_14] : memref<16x256xf32, #tpu.memory_space<vmem>>, vector<16x256xf32>
    %c0_15 = arith.constant 0 : index
    %c0_16 = arith.constant 0 : index
    %8 = vector.load %arg8[%c0_15, %c0_16] : memref<16x256xf32, #tpu.memory_space<vmem>>, vector<16x256xf32>
    %9 = tpu.iota {dimensions = array<i32: 1>} : vector<16x256xi32>
    %10 = tpu.iota {dimensions = array<i32: 0>} : vector<16x256xi32>
    %c255_i32 = arith.constant 255 : i32
    %11 = vector.broadcast %c255_i32 : i32 to vector<16x256xi32>
    %12 = arith.cmpi eq, %9, %11 : vector<16x256xi32>
    %c0_i32 = arith.constant 0 : i32
    %13 = vector.broadcast %c0_i32 : i32 to vector<16x256xi32>
    %14 = arith.cmpi eq, %9, %13 : vector<16x256xi32>
    %c15_i32 = arith.constant 15 : i32
    %15 = vector.broadcast %c15_i32 : i32 to vector<16x256xi32>
    %16 = arith.cmpi eq, %10, %15 : vector<16x256xi32>
    %c0_i32_17 = arith.constant 0 : i32
    %17 = vector.broadcast %c0_i32_17 : i32 to vector<16x256xi32>
    %18 = arith.cmpi eq, %10, %17 : vector<16x256xi32>
    %cst = arith.constant 5.000000e-01 : f32
    %cst_18 = arith.constant 0.288675129 : f32
    %19 = arith.mulf %cst, %cst_18 : f32
    %cst_19 = arith.constant 0.288675129 : f32
    %20 = vector.broadcast %cst_19 : f32 to vector<16x256xf32>
    %21 = arith.mulf %20, %4 : vector<16x256xf32>
    %cst_20 = arith.constant 1.000000e+00 : f32
    %22 = vector.broadcast %cst_20 : f32 to vector<16x256xf32>
    %23 = arith.addf %22, %21 : vector<16x256xf32>
    %cst_21 = arith.constant 1.000000e+00 : f32
    %24 = vector.broadcast %cst_21 : f32 to vector<16x256xf32>
    %25 = arith.divf %24, %23 : vector<16x256xf32>
    %cst_22 = arith.constant 0.288675129 : f32
    %26 = vector.broadcast %cst_22 : f32 to vector<16x256xf32>
    %27 = arith.mulf %26, %4 : vector<16x256xf32>
    %28 = arith.mulf %27, %5 : vector<16x256xf32>
    %cst_23 = arith.constant 0.288675129 : f32
    %29 = vector.broadcast %cst_23 : f32 to vector<16x256xf32>
    %30 = arith.mulf %29, %0 : vector<16x256xf32>
    %cst_24 = arith.constant 0.288675129 : f32
    %31 = vector.broadcast %cst_24 : f32 to vector<16x256xf32>
    %32 = arith.mulf %31, %1 : vector<16x256xf32>
    %cst_25 = arith.constant 0.288675129 : f32
    %33 = vector.broadcast %cst_25 : f32 to vector<16x256xf32>
    %34 = arith.mulf %33, %2 : vector<16x256xf32>
    %cst_26 = arith.constant 0.288675129 : f32
    %35 = vector.broadcast %cst_26 : f32 to vector<16x256xf32>
    %36 = arith.mulf %35, %3 : vector<16x256xf32>
    %cst_27 = arith.constant 0.288675129 : f32
    %37 = vector.broadcast %cst_27 : f32 to vector<16x256xf32>
    %38 = arith.mulf %37, %0 : vector<16x256xf32>
    %cst_28 = arith.constant 0.288675129 : f32
    %39 = vector.broadcast %cst_28 : f32 to vector<16x256xf32>
    %40 = arith.mulf %39, %1 : vector<16x256xf32>
    %cst_29 = arith.constant 0.288675129 : f32
    %41 = vector.broadcast %cst_29 : f32 to vector<16x256xf32>
    %42 = arith.mulf %41, %2 : vector<16x256xf32>
    %cst_30 = arith.constant 0.288675129 : f32
    %43 = vector.broadcast %cst_30 : f32 to vector<16x256xf32>
    %44 = arith.mulf %43, %3 : vector<16x256xf32>
    %cst_31 = arith.constant 0.000000e+00 : f32
    %45 = vector.broadcast %cst_31 : f32 to vector<16x256xf32>
    %cst_32 = arith.constant 0.288675129 : f32
    %cst_33 = arith.constant 9.99999968E-21 : f32
    %cst_34 = arith.constant 2.000000e+00 : f32
    %cst_35 = arith.constant 0.288675129 : f32
    %c0_i32_36 = arith.constant 0 : i32
    %c8_i32 = arith.constant 8 : i32
    %46 = arith.addi %c0_i32_36, %c8_i32 : i32
    %c1_i32 = arith.constant 1 : i32
    %47:11 = scf.for %arg12 = %c0_i32_36 to %46 step %c1_i32 iter_args(%arg13 = %6, %arg14 = %7, %arg15 = %8, %arg16 = %45, %arg17 = %45, %arg18 = %45, %arg19 = %45, %arg20 = %45, %arg21 = %6, %arg22 = %7, %arg23 = %8) -> (vector<16x256xf32>, vector<16x256xf32>, vector<16x256xf32>, vector<16x256xf32>, vector<16x256xf32>, vector<16x256xf32>, vector<16x256xf32>, vector<16x256xf32>, vector<16x256xf32>, vector<16x256xf32>, vector<16x256xf32>)  : i32 {
      %cst_43 = arith.constant 2.000000e+00 : f32
      %51 = vector.broadcast %cst_43 : f32 to vector<16x256xf32>
      %52 = arith.mulf %51, %arg13 : vector<16x256xf32>
      %53 = arith.subf %52, %arg21 : vector<16x256xf32>
      %cst_44 = arith.constant 2.000000e+00 : f32
      %54 = vector.broadcast %cst_44 : f32 to vector<16x256xf32>
      %55 = arith.mulf %54, %arg14 : vector<16x256xf32>
      %56 = arith.subf %55, %arg22 : vector<16x256xf32>
      %cst_45 = arith.constant 2.000000e+00 : f32
      %57 = vector.broadcast %cst_45 : f32 to vector<16x256xf32>
      %58 = arith.mulf %57, %arg15 : vector<16x256xf32>
      %59 = arith.subf %58, %arg23 : vector<16x256xf32>
      %c255_i32_46 = arith.constant 255 : i32
      %60 = tpu.dynamic_rotate %56 by %c255_i32_46 dim 1 : vector<16x256xf32>, i32 -> vector<16x256xf32>
      %61 = arith.subf %60, %56 : vector<16x256xf32>
      %cst_47 = arith.constant 0.000000e+00 : f32
      %62 = vector.broadcast %cst_47 : f32 to vector<16x256xf32>
      %63 = arith.select %12, %62, %61 : vector<16x256xi1>, vector<16x256xf32>
      %64 = vector.broadcast %cst_32 : f32 to vector<16x256xf32>
      %65 = arith.mulf %64, %63 : vector<16x256xf32>
      %66 = arith.addf %arg18, %65 : vector<16x256xf32>
      %c15_i32_48 = arith.constant 15 : i32
      %67 = tpu.dynamic_rotate %59 by %c15_i32_48 dim 0 : vector<16x256xf32>, i32 -> vector<16x256xf32>
      %68 = arith.subf %67, %59 : vector<16x256xf32>
      %cst_49 = arith.constant 0.000000e+00 : f32
      %69 = vector.broadcast %cst_49 : f32 to vector<16x256xf32>
      %70 = arith.select %16, %69, %68 : vector<16x256xi1>, vector<16x256xf32>
      %71 = vector.broadcast %cst_32 : f32 to vector<16x256xf32>
      %72 = arith.mulf %71, %70 : vector<16x256xf32>
      %73 = arith.addf %arg19, %72 : vector<16x256xf32>
      %c15_i32_50 = arith.constant 15 : i32
      %74 = tpu.dynamic_rotate %56 by %c15_i32_50 dim 0 : vector<16x256xf32>, i32 -> vector<16x256xf32>
      %75 = arith.subf %74, %56 : vector<16x256xf32>
      %cst_51 = arith.constant 0.000000e+00 : f32
      %76 = vector.broadcast %cst_51 : f32 to vector<16x256xf32>
      %77 = arith.select %16, %76, %75 : vector<16x256xi1>, vector<16x256xf32>
      %c255_i32_52 = arith.constant 255 : i32
      %78 = tpu.dynamic_rotate %59 by %c255_i32_52 dim 1 : vector<16x256xf32>, i32 -> vector<16x256xf32>
      %79 = arith.subf %78, %59 : vector<16x256xf32>
      %cst_53 = arith.constant 0.000000e+00 : f32
      %80 = vector.broadcast %cst_53 : f32 to vector<16x256xf32>
      %81 = arith.select %12, %80, %79 : vector<16x256xi1>, vector<16x256xf32>
      %82 = arith.addf %77, %81 : vector<16x256xf32>
      %83 = vector.broadcast %19 : f32 to vector<16x256xf32>
      %84 = arith.mulf %83, %82 : vector<16x256xf32>
      %85 = arith.addf %arg20, %84 : vector<16x256xf32>
      %86 = arith.mulf %66, %66 : vector<16x256xf32>
      %87 = arith.mulf %73, %73 : vector<16x256xf32>
      %88 = arith.addf %86, %87 : vector<16x256xf32>
      %cst_54 = arith.constant 2.000000e+00 : f32
      %89 = vector.broadcast %cst_54 : f32 to vector<16x256xf32>
      %90 = arith.mulf %89, %85 : vector<16x256xf32>
      %91 = arith.mulf %90, %85 : vector<16x256xf32>
      %92 = arith.addf %88, %91 : vector<16x256xf32>
      %93 = vector.broadcast %cst_33 : f32 to vector<16x256xf32>
      %94 = arith.addf %92, %93 : vector<16x256xf32>
      %95 = math.rsqrt %94 : vector<16x256xf32>
      %96 = vector.broadcast %cst_34 : f32 to vector<16x256xf32>
      %97 = arith.mulf %96, %95 : vector<16x256xf32>
      %cst_55 = arith.constant 1.000000e+00 : f32
      %98 = vector.broadcast %cst_55 : f32 to vector<16x256xf32>
      %99 = arith.minimumf %98, %97 : vector<16x256xf32>
      %100 = arith.mulf %66, %99 : vector<16x256xf32>
      %101 = arith.mulf %73, %99 : vector<16x256xf32>
      %102 = arith.mulf %85, %99 : vector<16x256xf32>
      %c1_i32_56 = arith.constant 1 : i32
      %103 = tpu.dynamic_rotate %100 by %c1_i32_56 dim 1 : vector<16x256xf32>, i32 -> vector<16x256xf32>
      %cst_57 = arith.constant 0.000000e+00 : f32
      %104 = vector.broadcast %cst_57 : f32 to vector<16x256xf32>
      %105 = arith.select %14, %104, %103 : vector<16x256xi1>, vector<16x256xf32>
      %cst_58 = arith.constant 0.000000e+00 : f32
      %106 = vector.broadcast %cst_58 : f32 to vector<16x256xf32>
      %107 = arith.select %12, %106, %100 : vector<16x256xi1>, vector<16x256xf32>
      %108 = arith.subf %107, %105 : vector<16x256xf32>
      %c1_i32_59 = arith.constant 1 : i32
      %109 = tpu.dynamic_rotate %102 by %c1_i32_59 dim 0 : vector<16x256xf32>, i32 -> vector<16x256xf32>
      %cst_60 = arith.constant 0.000000e+00 : f32
      %110 = vector.broadcast %cst_60 : f32 to vector<16x256xf32>
      %111 = arith.select %18, %110, %109 : vector<16x256xi1>, vector<16x256xf32>
      %cst_61 = arith.constant 0.000000e+00 : f32
      %112 = vector.broadcast %cst_61 : f32 to vector<16x256xf32>
      %113 = arith.select %16, %112, %102 : vector<16x256xi1>, vector<16x256xf32>
      %114 = arith.subf %113, %111 : vector<16x256xf32>
      %115 = arith.addf %108, %114 : vector<16x256xf32>
      %c1_i32_62 = arith.constant 1 : i32
      %116 = tpu.dynamic_rotate %102 by %c1_i32_62 dim 1 : vector<16x256xf32>, i32 -> vector<16x256xf32>
      %cst_63 = arith.constant 0.000000e+00 : f32
      %117 = vector.broadcast %cst_63 : f32 to vector<16x256xf32>
      %118 = arith.select %14, %117, %116 : vector<16x256xi1>, vector<16x256xf32>
      %cst_64 = arith.constant 0.000000e+00 : f32
      %119 = vector.broadcast %cst_64 : f32 to vector<16x256xf32>
      %120 = arith.select %12, %119, %102 : vector<16x256xi1>, vector<16x256xf32>
      %121 = arith.subf %120, %118 : vector<16x256xf32>
      %c1_i32_65 = arith.constant 1 : i32
      %122 = tpu.dynamic_rotate %101 by %c1_i32_65 dim 0 : vector<16x256xf32>, i32 -> vector<16x256xf32>
      %cst_66 = arith.constant 0.000000e+00 : f32
      %123 = vector.broadcast %cst_66 : f32 to vector<16x256xf32>
      %124 = arith.select %18, %123, %122 : vector<16x256xi1>, vector<16x256xf32>
      %cst_67 = arith.constant 0.000000e+00 : f32
      %125 = vector.broadcast %cst_67 : f32 to vector<16x256xf32>
      %126 = arith.select %16, %125, %101 : vector<16x256xi1>, vector<16x256xf32>
      %127 = arith.subf %126, %124 : vector<16x256xf32>
      %128 = arith.addf %121, %127 : vector<16x256xf32>
      %c255_i32_68 = arith.constant 255 : i32
      %129 = tpu.dynamic_rotate %53 by %c255_i32_68 dim 1 : vector<16x256xf32>, i32 -> vector<16x256xf32>
      %130 = arith.subf %129, %53 : vector<16x256xf32>
      %cst_69 = arith.constant 0.000000e+00 : f32
      %131 = vector.broadcast %cst_69 : f32 to vector<16x256xf32>
      %132 = arith.select %12, %131, %130 : vector<16x256xi1>, vector<16x256xf32>
      %133 = arith.subf %132, %56 : vector<16x256xf32>
      %c15_i32_70 = arith.constant 15 : i32
      %134 = tpu.dynamic_rotate %53 by %c15_i32_70 dim 0 : vector<16x256xf32>, i32 -> vector<16x256xf32>
      %135 = arith.subf %134, %53 : vector<16x256xf32>
      %cst_71 = arith.constant 0.000000e+00 : f32
      %136 = vector.broadcast %cst_71 : f32 to vector<16x256xf32>
      %137 = arith.select %16, %136, %135 : vector<16x256xi1>, vector<16x256xf32>
      %138 = arith.subf %137, %59 : vector<16x256xf32>
      %139 = arith.mulf %30, %133 : vector<16x256xf32>
      %140 = arith.addf %arg16, %139 : vector<16x256xf32>
      %141 = arith.mulf %32, %138 : vector<16x256xf32>
      %142 = arith.addf %140, %141 : vector<16x256xf32>
      %143 = arith.mulf %34, %133 : vector<16x256xf32>
      %144 = arith.addf %arg17, %143 : vector<16x256xf32>
      %145 = arith.mulf %36, %138 : vector<16x256xf32>
      %146 = arith.addf %144, %145 : vector<16x256xf32>
      %147 = arith.mulf %142, %142 : vector<16x256xf32>
      %148 = arith.mulf %146, %146 : vector<16x256xf32>
      %149 = arith.addf %147, %148 : vector<16x256xf32>
      %150 = vector.broadcast %cst_33 : f32 to vector<16x256xf32>
      %151 = arith.addf %149, %150 : vector<16x256xf32>
      %152 = math.rsqrt %151 : vector<16x256xf32>
      %cst_72 = arith.constant 1.000000e+00 : f32
      %153 = vector.broadcast %cst_72 : f32 to vector<16x256xf32>
      %154 = arith.minimumf %153, %152 : vector<16x256xf32>
      %155 = arith.mulf %142, %154 : vector<16x256xf32>
      %156 = arith.mulf %146, %154 : vector<16x256xf32>
      %157 = arith.mulf %38, %155 : vector<16x256xf32>
      %158 = arith.mulf %42, %156 : vector<16x256xf32>
      %159 = arith.addf %157, %158 : vector<16x256xf32>
      %160 = arith.mulf %40, %155 : vector<16x256xf32>
      %161 = arith.mulf %44, %156 : vector<16x256xf32>
      %162 = arith.addf %160, %161 : vector<16x256xf32>
      %c1_i32_73 = arith.constant 1 : i32
      %163 = tpu.dynamic_rotate %159 by %c1_i32_73 dim 1 : vector<16x256xf32>, i32 -> vector<16x256xf32>
      %cst_74 = arith.constant 0.000000e+00 : f32
      %164 = vector.broadcast %cst_74 : f32 to vector<16x256xf32>
      %165 = arith.select %14, %164, %163 : vector<16x256xi1>, vector<16x256xf32>
      %cst_75 = arith.constant 0.000000e+00 : f32
      %166 = vector.broadcast %cst_75 : f32 to vector<16x256xf32>
      %167 = arith.select %12, %166, %159 : vector<16x256xi1>, vector<16x256xf32>
      %168 = arith.subf %167, %165 : vector<16x256xf32>
      %169 = arith.addf %arg13, %168 : vector<16x256xf32>
      %c1_i32_76 = arith.constant 1 : i32
      %170 = tpu.dynamic_rotate %162 by %c1_i32_76 dim 0 : vector<16x256xf32>, i32 -> vector<16x256xf32>
      %cst_77 = arith.constant 0.000000e+00 : f32
      %171 = vector.broadcast %cst_77 : f32 to vector<16x256xf32>
      %172 = arith.select %18, %171, %170 : vector<16x256xi1>, vector<16x256xf32>
      %cst_78 = arith.constant 0.000000e+00 : f32
      %173 = vector.broadcast %cst_78 : f32 to vector<16x256xf32>
      %174 = arith.select %16, %173, %162 : vector<16x256xi1>, vector<16x256xf32>
      %175 = arith.subf %174, %172 : vector<16x256xf32>
      %176 = arith.addf %169, %175 : vector<16x256xf32>
      %177 = arith.addf %176, %28 : vector<16x256xf32>
      %178 = arith.mulf %177, %25 : vector<16x256xf32>
      %179 = arith.addf %arg14, %159 : vector<16x256xf32>
      %180 = vector.broadcast %cst_35 : f32 to vector<16x256xf32>
      %181 = arith.mulf %180, %115 : vector<16x256xf32>
      %182 = arith.addf %179, %181 : vector<16x256xf32>
      %183 = arith.addf %arg15, %162 : vector<16x256xf32>
      %184 = vector.broadcast %cst_35 : f32 to vector<16x256xf32>
      %185 = arith.mulf %184, %128 : vector<16x256xf32>
      %186 = arith.addf %183, %185 : vector<16x256xf32>
      scf.yield %178, %182, %186, %155, %156, %100, %101, %102, %arg13, %arg14, %arg15 : vector<16x256xf32>, vector<16x256xf32>, vector<16x256xf32>, vector<16x256xf32>, vector<16x256xf32>, vector<16x256xf32>, vector<16x256xf32>, vector<16x256xf32>, vector<16x256xf32>, vector<16x256xf32>, vector<16x256xf32>
    }
    %c0_37 = arith.constant 0 : index
    %c0_38 = arith.constant 0 : index
    %48 = vector.load %arg9[%c0_37, %c0_38] : memref<16x256xf32, #tpu.memory_space<vmem>>, vector<16x256xf32>
    tpu.vector_store %arg9[%c0_37, %c0_38], %47#0 {strides = array<i32>} : memref<16x256xf32, #tpu.memory_space<vmem>>, vector<16x256xf32>,
    %c0_39 = arith.constant 0 : index
    %c0_40 = arith.constant 0 : index
    %49 = vector.load %arg10[%c0_39, %c0_40] : memref<16x256xf32, #tpu.memory_space<vmem>>, vector<16x256xf32>
    tpu.vector_store %arg10[%c0_39, %c0_40], %47#1 {strides = array<i32>} : memref<16x256xf32, #tpu.memory_space<vmem>>, vector<16x256xf32>,
    %c0_41 = arith.constant 0 : index
    %c0_42 = arith.constant 0 : index
    %50 = vector.load %arg11[%c0_41, %c0_42] : memref<16x256xf32, #tpu.memory_space<vmem>>, vector<16x256xf32>
    tpu.vector_store %arg11[%c0_41, %c0_42], %47#2 {strides = array<i32>} : memref<16x256xf32, #tpu.memory_space<vmem>>, vector<16x256xf32>,
    return
  }
}

</mosaic_0001>

<bundles_post_ra>
// kernel: tgv_inpaint.1
= control target key start
LH: loop header
LB: loop body
LE: loop exit
PB: predicated region body
PF: predicated region fallthrough
CT: control target
= control target key end

     0   :  { %v71_v0 = vlaneseq  ;;  %s2929_s0 = inlined_call_operand.vmem [shape: f32[16,256], index: 0, kind: input, shape index: {}]   ;;  %s2930_s9 = inlined_call_operand.vmem [shape: f32[16,256], index: 9, kind: output, shape index: {0}, may-alias: {6,9}]   ;;  %s2931_s10 = inlined_call_operand.vmem [shape: f32[16,256], index: 10, kind: output, shape index: {1}, may-alias: {7,10}]   ;;  %s2932_s11 = inlined_call_operand.vmem [shape: f32[16,256], index: 11, kind: output, shape index: {2}, may-alias: {8,11}]   ;;  %s2933_s4 = inlined_call_operand.vmem [shape: f32[16,256], index: 4, kind: input, shape index: {}]   ;;  %s2934_s5 = inlined_call_operand.vmem [shape: f32[16,256], index: 5, kind: input, shape index: {}]   ;;  %s2935_s1 = inlined_call_operand.vmem [shape: f32[16,256], index: 1, kind: input, shape index: {}]   ;;  %s2936_s2 = inlined_call_operand.vmem [shape: f32[16,256], index: 2, kind: input, shape index: {}]   ;;  %s2937_s6 = inlined_call_operand.vmem [shape: f32[16,256], index: 6, kind: input, shape index: {}, may-alias: {6,9}]   ;;  %s2938_s3 = inlined_call_operand.vmem [shape: f32[16,256], index: 3, kind: input, shape index: {}]   ;;  %s2939_s7 = inlined_call_operand.vmem [shape: f32[16,256], index: 7, kind: input, shape index: {}, may-alias: {7,10}]   ;;  %s2940_s8 = inlined_call_operand.vmem [shape: f32[16,256], index: 8, kind: input, shape index: {}, may-alias: {8,11}]  }
   0x1   :  { %v35_v1 = vld [vmem:[%s2929_s0] sm:$0xff]  ;;  %v36_v2 = vld [vmem:[%s2929_s0 + $0x8] sm:$0xff]  ;;  %v37_v9 = vld [vmem:[%s2929_s0 + $0x10] sm:$0xff] }
   0x2   :  { %v1638_v3 = vand.u32 127, %v71_v0  ;;  %v1640_v4 = vshrl.u32 %v71_v0, 7  ;;  %v1642_v5 = vmul.f32 0.28867513, %v35_v1  ;;  %v1652_v8 = vmul.f32 0.28867513, %v36_v2 }
   0x3   :  { %v51_v10 = vld [vmem:[%s2933_s4] sm:$0xff]  ;;  %v52_v11 = vld [vmem:[%s2933_s4 + $0x8] sm:$0xff]  ;;  %v38_v12 = vld [vmem:[%s2929_s0 + $0x18] sm:$0xff]  ;;  %v1773_v50 = vmul.f32 0.28867513, %v37_v9 }
   0x4   :  { %3000 = vst [vmem:[#allocation2_spill] sm:$0xff] %v1638_v3  ;;  %3001 = vst [vmem:[#allocation3_spill] sm:$0xff] %v1640_v4  ;;  %v1645_v6 = vadd.s32 128, %v1638_v3  ;;  %v1648_v7 = vadd.s32 8, %v1640_v4  ;;  %vm79_vm0 = vcmp.eq.s32.totalorder %v1638_v3, 0  ;;  %vm83_vm1 = vcmp.eq.s32.totalorder %v1640_v4, 0 }
   0x5   :  { %3002 = vst [vmem:[#allocation4_spill] sm:$0xff] %v1642_v5  ;;  %3005 = vst [vmem:[#allocation7_spill] sm:$0xff] %v1652_v8  ;;  %v53_v13 = vld [vmem:[%s2933_s4 + $0x10] sm:$0xff]  ;;  %v54_v14 = vld [vmem:[%s2933_s4 + $0x18] sm:$0xff]  ;;  %v85_v16 = vmul.f32 0.28867513, %v51_v10 }
   0x6   :  { %3003 = vst [vmem:[#allocation5_spill] sm:$0xff] %v1645_v6  ;;  %3004 = vst [vmem:[#allocation6_spill] sm:$0xff] %v1648_v7  ;;  %vm78_vm2 = vcmp.eq.s32.totalorder %v1645_v6, 255  ;;  %vm82_vm3 = vcmp.eq.s32.totalorder %v1648_v7, 15  ;;  %v55_v15 = vld [vmem:[%s2934_s5] sm:$0xff]  ;;  %v40_v18 = vld [vmem:[%s2935_s1 + $0x8] sm:$0xff] }
   0x7   :  { %v39_v17 = vld [vmem:[%s2935_s1] sm:$0xff]  ;;  %v41_v19 = vld [vmem:[%s2935_s1 + $0x10] sm:$0xff]  ;;  %v56_v20 = vld [vmem:[%s2934_s5 + $0x8] sm:$0xff]  ;;  %v86_v23 = vmul.f32 0.28867513, %v52_v11  ;;  %v89_v31 = vadd.f32 1.0, %v85_v16  ;;  %v1719_v32 = vmul.f32 %v85_v16, %v55_v15 }
   0x8   :  { %v57_v21 = vld [vmem:[%s2934_s5 + $0x10] sm:$0xff]  ;;  %v58_v22 = vld [vmem:[%s2934_s5 + $0x18] sm:$0xff]  ;;  %v43_v25 = vld [vmem:[%s2936_s2] sm:$0xff]  ;;  %v87_v30 = vmul.f32 0.28867513, %v53_v13  ;;  %3009 = vst [vmem:[#allocation11_spill] sm:$0xff] %v1773_v50 }
   0x9   :  { %v42_v24 = vld [vmem:[%s2935_s1 + $0x18] sm:$0xff]  ;;  %v44_v26 = vld [vmem:[%s2936_s2 + $0x8] sm:$0xff]  ;;  %v1707_v27 = vld [vmem:[%s2937_s6] sm:$0xff]   ;;  %3006 = vst [vmem:[#allocation8_spill] sm:$0xff] %v1719_v32  ;;  %v88_v39 = vmul.f32 0.28867513, %v54_v14  ;;  %v1745_v41 = vmul.f32 %v86_v23, %v56_v20  ;;  %1186 = vrcp.f32 %v89_v31 }
   0xa   :  { %v1712_v28 = vld [vmem:[%s2937_s6 + $0x8] sm:$0xff]   ;;  %v1717_v29 = vld [vmem:[%s2937_s6 + $0x10] sm:$0xff]   ;;  %v46_v34 = vld [vmem:[%s2936_s2 + $0x18] sm:$0xff]  ;;  %v90_v40 = vadd.f32 1.0, %v86_v23  ;;  %v91_v48 = vadd.f32 1.0, %v87_v30  ;;  %v1771_v49 = vmul.f32 %v87_v30, %v57_v21  ;;  %v1853_v30 = vmov 0.0  }
   0xb   :  { %v45_v33 = vld [vmem:[%s2936_s2 + $0x10] sm:$0xff]  ;;  %v47_v35 = vld [vmem:[%s2938_s3] sm:$0xff]  ;;  %v1733_v36 = vld [vmem:[%s2937_s6 + $0x18] sm:$0xff]   ;;  %3007 = vst [vmem:[#allocation9_spill] sm:$0xff] %v1745_v41  ;;  %v92_v54 = vadd.f32 1.0, %v88_v39  ;;  %v1784_v55 = vmul.f32 %v88_v39, %v58_v22  ;;  %v1855_v31 = vmov 0.0  }
   0xc   :  { %v1738_v37 = vld [vmem:[%s2939_s7] sm:$0xff]   ;;  %v1743_v38 = vld [vmem:[%s2939_s7 + $0x8] sm:$0xff]   ;;  %v49_v43 = vld [vmem:[%s2938_s3 + $0x10] sm:$0xff]  ;;  %3008 = vst [vmem:[#allocation10_spill] sm:$0xff] %v1771_v49  ;;  %1188 = vrcp.f32 %v90_v40  ;;  %v1786_v56 = vmul.f32 0.28867513, %v38_v12  ;;  %v3036_v23 = vmov %v1733_v36 }
   0xd   :  { %v48_v42 = vld [vmem:[%s2938_s3 + $0x8] sm:$0xff]  ;;  %v50_v44 = vld [vmem:[%s2938_s3 + $0x18] sm:$0xff]  ;;  %v1759_v45 = vld [vmem:[%s2939_s7 + $0x10] sm:$0xff]   ;;  %3010 = vst [vmem:[#allocation12_spill] sm:$0xff] %v1784_v55  ;;  %1190 = vrcp.f32 %v91_v48  ;;  %v1788_v57 = vmul.f32 0.28867513, %v39_v17  ;;  %v3034_v21 = vmov %v1743_v38  ;;  %v3035_v22 = vmov %v1738_v37 }
   0xe   :  { %v1764_v46 = vld [vmem:[%s2939_s7 + $0x18] sm:$0xff]   ;;  %v1769_v47 = vld [vmem:[%s2940_s8] sm:$0xff]   ;;  %v68_v51 = vld [vmem:[%s2940_s8 + $0x8] sm:$0xff]   ;;  %3011 = vst [vmem:[#allocation13_spill] sm:$0xff] %v1786_v56  ;;  %v1790_v58 = vmul.f32 0.28867513, %v40_v18  ;;  %1192 = vrcp.f32 %v92_v54  ;;  %v3033_v20 = vmov %v1759_v45 }
   0xf   :  { %v69_v52 = vld [vmem:[%s2940_s8 + $0x10] sm:$0xff]   ;;  %v70_v53 = vld [vmem:[%s2940_s8 + $0x18] sm:$0xff]   ;;  %3012 = vst [vmem:[#allocation14_spill] sm:$0xff] %v1788_v57  ;;  %v1792_v59 = vmul.f32 0.28867513, %v41_v19  ;;  %v3030_v17 = vmov %v68_v51  ;;  %v3031_v18 = vmov %v1769_v47  ;;  %v3032_v19 = vmov %v1764_v46  ;;  %s1926_s8 = smov 0  }
  0x10   :  { %3013 = vst [vmem:[#allocation15_spill] sm:$0xff] %v1790_v58  ;;  %v1794_v60 = vmul.f32 0.28867513, %v42_v24  ;;  %v1796_v61 = vmul.f32 0.28867513, %v43_v25  ;;  %v3028_v15 = vmov %v70_v53  ;;  %v3029_v16 = vmov %v69_v52 }
  0x11   :  { %3014 = vst [vmem:[#allocation16_spill] sm:$0xff] %v1792_v59  ;;  %v1798_v62 = vmul.f32 0.28867513, %v44_v26  ;;  %v1800_v63 = vmul.f32 0.28867513, %v45_v33  ;;  %v3037_v24 = vmov %v1717_v29  ;;  %v3038_v25 = vmov %v1712_v28 }
  0x12   :  { %3015 = vst [vmem:[#allocation17_spill] sm:$0xff] %v1794_v60  ;;  %3016 = vst [vmem:[#allocation18_spill] sm:$0xff] %v1796_v61  ;;  %v1802_v0 = vmul.f32 0.28867513, %v46_v34  ;;  %v1804_v1 = vmul.f32 0.28867513, %v47_v35  ;;  %v3039_v26 = vmov %v1707_v27 }
  0x13   :  { %3017 = vst [vmem:[#allocation19_spill] sm:$0xff] %v1798_v62  ;;  %3018 = vst [vmem:[#allocation20_spill] sm:$0xff] %v1800_v63  ;;  %v1806_v2 = vmul.f32 0.28867513, %v48_v42  ;;  %v1808_v9 = vmul.f32 0.28867513, %v49_v43 }
  0x14   :  { %3019 = vst [vmem:[#allocation21_spill] sm:$0xff] %v1802_v0  ;;  %3020 = vst [vmem:[#allocation22_spill] sm:$0xff] %v1804_v1  ;;  %v1810_v10 = vmul.f32 0.28867513, %v50_v44  ;;  %v1857_v33 = vmov 0.0   ;;  %v1859_v34 = vmov 0.0  }
  0x15   :  { %3021 = vst [vmem:[#allocation23_spill] sm:$0xff] %v1806_v2  ;;  %3022 = vst [vmem:[#allocation24_spill] sm:$0xff] %v1808_v9  ;;  %v1861_v35 = vmov 0.0   ;;  %v1863_v39 = vmov 0.0   ;;  %v1865_v40 = vmov 0.0   ;;  %v1867_v42 = vmov 0.0  }
  0x16   :  { %3023 = vst [vmem:[#allocation25_spill] sm:$0xff] %v1810_v10  ;;  %v1812_v11 = vpop.eup %1186  ;;  %v1869_v43 = vmov 0.0   ;;  %v1871_v44 = vmov 0.0   ;;  %v1873_v48 = vmov 0.0   ;;  %v1875_v54 = vmov 0.0  }
  0x17   :  { %3024 = vst [vmem:[#allocation26_spill] sm:$0xff] %v1812_v11  ;;  %v1881_v49 = vmov 0.0   ;;  %v1883_v11 = vmov 0.0   ;;  %v1885_v55 = vmov 0.0   ;;  %v1889_v32 = vmov 0.0  }
  0x18   :  { %v1891_v41 = vmov 0.0  }
  0x19   :  { %v1814_v12 = vpop.eup %1188 }
  0x1a   :  { %3025 = vst [vmem:[#allocation27_spill] sm:$0xff] %v1814_v12  ;;  %v1816_v13 = vpop.eup %1190  ;;  %v1887_v12 = vmov 0.0  }
  0x1b   :  { %3026 = vst [vmem:[#allocation28_spill] sm:$0xff] %v1816_v13  ;;  %v1818_v14 = vpop.eup %1192  ;;  %v1877_v13 = vmov 0.0  }
  0x1c   :  { %3027 = vst [vmem:[#allocation29_spill] sm:$0xff] %v1818_v14  ;;  %v1879_v14 = vmov 0.0  }
  0x1d LB: > { %v3040_v3 = vld [vmem:[#allocation2_spill] sm:$0xff]  ;;  %v3042_v4 = vld [vmem:[#allocation3_spill] sm:$0xff]  ;;  %v3043_v63 = vld [vmem:[#allocation20_spill] sm:$0xff]  ;;  %3060 = vst [vmem:[#allocation30_spill] sm:$0xff] %v1440_v30  ;;  %v173_v30 = vmul.f32 2.0, %v1556_v29  ;;  %s1570_s0 = smov 127   ;;  %v1468_v42 = vphi %v1867_v42, %v3160_v42   ;;  %v1464_v40 = vphi %v1865_v40, %v2479_v40   ;;  %v1460_v39 = vphi %v1863_v39, %v3159_v39   ;;  %v1456_v35 = vphi %v1861_v35, %v2527_v35   ;;  %v1452_v34 = vphi %v1859_v34, %v2431_v34   ;;  %v1448_v33 = vphi %v1857_v33, %v2425_v33   ;;  %v1444_v31 = vphi %v1855_v31, %v3158_v31   ;;  %v1440_v30 = vphi %v1853_v30, %v2443_v30   ;;  %v1436_v26 = vphi %v3039_v26, %v3157_v26   ;;  %v1432_v25 = vphi %v3038_v25, %v3156_v25   ;;  %v1428_v24 = vphi %v3037_v24, %v3155_v24   ;;  %v1424_v23 = vphi %v3036_v23, %v3129_v23   ;;  %v1420_v22 = vphi %v3035_v22, %v3154_v22   ;;  %v1416_v21 = vphi %v3034_v21, %v3118_v21   ;;  %v1412_v20 = vphi %v3033_v20, %v3153_v20   ;;  %v1408_v19 = vphi %v3032_v19, %v3152_v19   ;;  %v1404_v18 = vphi %v3031_v18, %v3121_v18   ;;  %v1400_v17 = vphi %v3030_v17, %v3148_v17   ;;  %v1396_v16 = vphi %v3029_v16, %v3150_v16   ;;  %v1392_v15 = vphi %v3028_v15, %v3144_v15   ;;  %s1568_s8 = sphi %s1926_s8, %s3183_s8   ;;  %v1564_v27 = vphi %v1707_v27, %v3182_v27   ;;  %v1560_v28 = vphi %v1712_v28, %v3181_v28   ;;  %v1556_v29 = vphi %v1717_v29, %v3180_v29   ;;  %v1552_v36 = vphi %v1733_v36, %v3179_v36   ;;  %v1548_v37 = vphi %v1738_v37, %v3178_v37   ;;  %v1544_v38 = vphi %v1743_v38, %v3177_v38   ;;  %v1540_v45 = vphi %v1759_v45, %v3176_v45   ;;  %v1536_v46 = vphi %v1764_v46, %v3175_v46   ;;  %v1532_v47 = vphi %v1769_v47, %v3174_v47   ;;  %v1528_v51 = vphi %v68_v51, %v3173_v51   ;;  %v1524_v52 = vphi %v69_v52, %v3172_v52   ;;  %v1520_v53 = vphi %v70_v53, %v3171_v53   ;;  %v1516_v41 = vphi %v1891_v41, %v3170_v41   ;;  %v1512_v32 = vphi %v1889_v32, %v3169_v32   ;;  %v1508_v12 = vphi %v1887_v12, %v3168_v12   ;;  %v1504_v55 = vphi %v1885_v55, %v3167_v55   ;;  %v1500_v11 = vphi %v1883_v11, %v3166_v11   ;;  %v1496_v49 = vphi %v1881_v49, %v3165_v49   ;;  %v1492_v14 = vphi %v1879_v14, %v2385_v14   ;;  %v1488_v13 = vphi %v1877_v13, %v3164_v13   ;;  %v1484_v54 = vphi %v1875_v54, %v3163_v54   ;;  %v1480_v48 = vphi %v1873_v48, %v3162_v48   ;;  %v1476_v44 = vphi %v1871_v44, %v2428_v44   ;;  %v1472_v43 = vphi %v1869_v43, %v3161_v43  }
  0x1e   : > { %v3044_v62 = vld [vmem:[#allocation19_spill] sm:$0xff]  ;;  %v3045_v61 = vld [vmem:[#allocation18_spill] sm:$0xff]  ;;  %v3046_v60 = vld [vmem:[#allocation17_spill] sm:$0xff]  ;;  %3061 = vst [vmem:[#allocation31_spill] sm:$0xff] %v1444_v31  ;;  %v174_v31 = vmul.f32 2.0, %v1552_v36  ;;  %vm228_vm4 = vcmp.lt.s32.totalorder %v3042_v4, 7 }
  0x1f   : > { %v3047_v59 = vld [vmem:[#allocation16_spill] sm:$0xff]  ;;  %v3048_v58 = vld [vmem:[#allocation15_spill] sm:$0xff]  ;;  %v3049_v57 = vld [vmem:[#allocation14_spill] sm:$0xff]  ;;  %3062 = vst [vmem:[#allocation32_spill] sm:$0xff] %v1448_v33  ;;  %v2061_v33 = vsub.f32 %v173_v30, %v1428_v24  ;;  %v179_v24 = vmul.f32 2.0, %v1548_v37  ;;  %vm203_vm5 = vcmp.lt.s32.totalorder %v3040_v3, 127 }
  0x20   : > { %v3050_v56 = vld [vmem:[#allocation13_spill] sm:$0xff]  ;;  %v3051_v50 = vld [vmem:[#allocation11_spill] sm:$0xff]  ;;  %v3053_v9 = vld [vmem:[#allocation24_spill] sm:$0xff]  ;;  %3063 = vst [vmem:[#allocation33_spill] sm:$0xff] %v1452_v34  ;;  %v2063_v34 = vsub.f32 %v174_v31, %v1424_v23  ;;  %v182_v31 = vmul.f32 2.0, %v1536_v46  ;;  %s1571_s20 = smov 1  }
  0x21   : > { %v3052_v10 = vld [vmem:[#allocation25_spill] sm:$0xff]  ;;  %v3055_v8 = vld [vmem:[#allocation7_spill] sm:$0xff]  ;;  %v3056_v5 = vld [vmem:[#allocation4_spill] sm:$0xff]  ;;  %3064 = vst [vmem:[#allocation34_spill] sm:$0xff] %v1472_v43  ;;  %v171_v43 = vmul.f32 2.0, %v1564_v27  ;;  %vm378_vm6 = vcmp.lt.s32.totalorder %v3042_v4, 1 }
  0x22   : > { %v3054_v0 = vld [vmem:[#allocation21_spill] sm:$0xff]  ;;  %v3057_v2 = vld [vmem:[#allocation23_spill] sm:$0xff]  ;;  %v3058_v1 = vld [vmem:[#allocation22_spill] sm:$0xff]  ;;  %3065 = vst [vmem:[#allocation35_spill] sm:$0xff] %v1476_v44  ;;  %v172_v44 = vmul.f32 2.0, %v1560_v28  ;;  %vm357_vm7 = vcmp.lt.s32.totalorder %v3040_v3, 1 }
  0x23   : > { %3066 = vst [vmem:[#allocation36_spill] sm:$0xff] %v1480_v48  ;;  %3067 = vst [vmem:[#allocation37_spill] sm:$0xff] %v1484_v54  ;;  %v2053_v48 = vsub.f32 %v171_v43, %v1436_v26  ;;  %v189_v26 = vmul.f32 2.0, %v1524_v52  ;;  %v188_v43 = vmul.f32 2.0, %v1528_v51  ;;  %s126_s21 = sadd.s32 1, %s1568_s8  }
  0x24   : > { %3068 = vst [vmem:[#allocation38_spill] sm:$0xff] %v1488_v13  ;;  %3069 = vst [vmem:[#allocation39_spill] sm:$0xff] %v1504_v55  ;;  %v2055_v54 = vsub.f32 %v172_v44, %v1432_v25  ;;  %p2751_p0 = scmp.ge.s32.totalorder %s126_s21, 8   ;;  %s3183_s8 = smov %s126_s21 }
  0x25   : > { %3070 = vst [vmem:[#allocation40_spill] sm:$0xff] %v1520_v53  ;;  %3071 = vst [vmem:[#allocation41_spill] sm:$0xff] %v1524_v52  ;;  %447 = vrot.lane.b32.xlu0 %v2053_v48, %s1570_s0  ;;  %v2072_v44 = vsub.f32 %v189_v26, %v1396_v16  ;;  %v2078_v23 = vsub.f32 %v188_v43, %v1400_v17  ;;  %v2088_v16 = vsub.f32 %v179_v24, %v1420_v22 }
  0x26   : > { %3072 = vst [vmem:[#allocation42_spill] sm:$0xff] %v1528_v51  ;;  %3073 = vst [vmem:[#allocation43_spill] sm:$0xff] %v1532_v47  ;;  %451 = vrot.lane.b32.xlu1 %v2055_v54, %s1570_s0  ;;  %v180_v17 = vmul.f32 2.0, %v1544_v38  ;;  %v472_v22 = vrot.slane %v2055_v54, 1  ;;  %v473_v26 = vrot.slane %v2061_v33, 1  ;;  %v474_v43 = vrot.slane %v2063_v34, 1 }
  0x27   : > { %3074 = vst [vmem:[#allocation44_spill] sm:$0xff] %v1536_v46  ;;  %3075 = vst [vmem:[#allocation45_spill] sm:$0xff] %v1540_v45 }
  0x28   : > { %3076 = vst [vmem:[#allocation46_spill] sm:$0xff] %v1544_v38  ;;  %3077 = vst [vmem:[#allocation47_spill] sm:$0xff] %v1548_v37 }
  0x29   : > { %3078 = vst [vmem:[#allocation48_spill] sm:$0xff] %v1552_v36  ;;  %3079 = vst [vmem:[#allocation49_spill] sm:$0xff] %v1556_v29  ;;  %449 = vrot.lane.b32.xlu0 %v2061_v33, %s1570_s0  ;;  %v190_v29 = vmul.f32 2.0, %v1520_v53 }
  0x2a   : > { %3080 = vst [vmem:[#allocation50_spill] sm:$0xff] %v1560_v28  ;;  %3081 = vst [vmem:[#allocation51_spill] sm:$0xff] %v1564_v27  ;;  %v187_v27 = vmul.f32 2.0, %v1532_v47  ;;  %453 = vrot.lane.b32.xlu1 %v2063_v34, %s1570_s0 }
  0x2c   : > { %v2068_v25 = vsub.f32 %v187_v27, %v1404_v18  ;;  %v2082_v27 = vsub.f32 %v190_v29, %v1392_v15  ;;  %v181_v18 = vmul.f32 2.0, %v1540_v45  ;;  %v2098_v29 = vsub.f32 %v180_v17, %v1416_v21 }
  0x2d   : > { %v2101_v15 = vsub.f32 %v182_v31, %v1408_v19  ;;  %v225_v21 = vrot.slane %v2078_v23, 1  ;;  %v249_v17 = vrot.slane %v2088_v16, 1 }
  0x2e   : > { %265 = vrot.lane.b32.xlu0 %v2068_v25, %s1570_s0  ;;  %267 = vrot.lane.b32.xlu1 %v2072_v44, %s1570_s0  ;;  %v2091_v30 = vsub.f32 %v181_v18, %v1412_v20  ;;  %v471_v20 = vrot.slane %v2053_v48, 1  ;;  %v224_v24 = vrot.slane %v2068_v25, 1  ;;  %v226_v18 = vrot.slane %v2072_v44, 1 }
  0x2f   : > { %v227_v19 = vrot.slane %v2082_v27, 1  ;;  %v250_v52 = vrot.slane %v2098_v29, 1  ;;  %v252_v51 = vrot.slane %v2101_v15, 1 }
  0x30   : > { %v251_v31 = vrot.slane %v2091_v30, 1  ;;  %v229_v53 = vsel %vm228_vm4, %v224_v24, %v226_v18  ;;  %v231_v47 = vsel %vm228_vm4, %v226_v18, %v224_v24 }
  0x31   : > { %v230_v36 = vsel %vm228_vm4, %v225_v21, %v227_v19  ;;  %v256_v46 = vsel %vm228_vm4, %v252_v51, %v250_v52  ;;  %v2134_v37 = vsel %vm228_vm4, %v250_v52, %v252_v51  ;;  %v233_v38 = vsub.f32 %v229_v53, %v2068_v25 }
  0x32   : > { %269 = vrot.lane.b32.xlu0 %v2078_v23, %s1570_s0  ;;  %271 = vrot.lane.b32.xlu1 %v2082_v27, %s1570_s0  ;;  %v255_v28 = vsel %vm228_vm4, %v251_v31, %v249_v17  ;;  %v2126_v45 = vsel %vm228_vm4, %v249_v17, %v251_v31  ;;  %v234_v13 = vsub.f32 %v230_v36, %v2078_v23 }
  0x33   : > { %v232_v55 = vsel %vm228_vm4, %v227_v19, %v225_v21  ;;  %v259_v17 = vsub.f32 %v255_v28, %v2091_v30  ;;  %v477_v31 = vsel %vm228_vm4, %v473_v26, %v471_v20  ;;  %v260_v24 = vsub.f32 %v256_v46, %v2101_v15 }
  0x34   : > { %v235_v18 = vsub.f32 %v231_v47, %v2072_v44  ;;  %v236_v52 = vsub.f32 %v232_v55, %v2082_v27  ;;  %v475_v53 = vsel %vm228_vm4, %v471_v20, %v473_v26  ;;  %v241_v21 = vmul.f32 0.28867513, %v233_v38 }
  0x35   : > { %v242_v28 = vmul.f32 0.28867513, %v234_v13  ;;  %v481_v19 = vsub.f32 %v477_v31, %v2061_v33  ;;  %v2156_v46 = vsel %vm82_vm3, 0.0, %v259_v17  ;;  %v2160_v47 = vsel %vm82_vm3, 0.0, %v260_v24 }
  0x36   : > { %195 = vrot.lane.b32.xlu0 %v2088_v16, %s1570_s0  ;;  %197 = vrot.lane.b32.xlu1 %v2091_v30, %s1570_s0  ;;  %3082 = vst [vmem:[#allocation52_spill] sm:$0xff] %v2156_v46  ;;  %3083 = vst [vmem:[#allocation53_spill] sm:$0xff] %v2160_v47  ;;  %v239_v36 = vsel %vm82_vm3, 0.0, %v235_v18  ;;  %v479_v55 = vsub.f32 %v475_v53, %v2053_v48  ;;  %v478_v20 = vsel %vm228_vm4, %v474_v43, %v472_v22 }
  0x37   : > { %v240_v38 = vsel %vm82_vm3, 0.0, %v236_v52  ;;  %v2170_v13 = vadd.f32 %v1468_v42, %v241_v21  ;;  %v2173_v26 = vadd.f32 %v1464_v40, %v242_v28  ;;  %v485_v17 = vsel %vm82_vm3, 0.0, %v481_v19 }
  0x38   : > { %v243_v31 = vmul.f32 0.28867513, %v239_v36  ;;  %v482_v24 = vsub.f32 %v478_v20, %v2063_v34  ;;  %v244_v18 = vmul.f32 0.28867513, %v240_v38  ;;  %v487_v53 = vsub.f32 %v479_v55, %v2068_v25 }
  0x39   : > { %3084 = vst [vmem:[#allocation54_spill] sm:$0xff] %v2170_v13  ;;  %3085 = vst [vmem:[#allocation55_spill] sm:$0xff] %v2173_v26  ;;  %v489_v46 = vsub.f32 %v485_v17, %v2072_v44  ;;  %v476_v42 = vsel %vm228_vm4, %v472_v22, %v474_v43  ;;  %v2188_v36 = vmul.f32 %v2170_v13, %v2170_v13 }
  0x3a   : > { %199 = vrot.lane.b32.xlu0 %v2098_v29, %s1570_s0  ;;  %201 = vrot.lane.b32.xlu1 %v2101_v15, %s1570_s0  ;;  %v2192_v21 = vmul.f32 %v2173_v26, %v2173_v26  ;;  %v2197_v22 = vadd.f32 %v1460_v39, %v243_v31  ;;  %v486_v43 = vsel %vm82_vm3, 0.0, %v482_v24  ;;  %v515_v55 = vmul.f32 %v487_v53, %v3058_v1 }
  0x3b   : > { %v480_v20 = vsub.f32 %v476_v42, %v2055_v54  ;;  %v501_v31 = vmul.f32 %v489_v46, %v3047_v59  ;;  %v517_v24 = vmul.f32 %v489_v46, %v3053_v9 }
  0x3c   : > { %3086 = vst [vmem:[#allocation56_spill] sm:$0xff] %v2197_v22 }
  0x97   : > { %v448_v51 = vpop.permute.xlu0 %447 }
  0x98   : > { %v452_v47 = vpop.permute.xlu1 %451 }
  0x99   : > { %v455_v40 = vsel %vm203_vm5, %v448_v51, %v452_v47  ;;  %v457_v52 = vsel %vm203_vm5, %v452_v47, %v448_v51  ;;  %v2202_v51 = vadd.f32 %v1456_v35, %v244_v18  ;;  %v499_v47 = vmul.f32 %v487_v53, %v3049_v57 }
  0x9a   : > { %v459_v28 = vsub.f32 %v455_v40, %v2053_v48  ;;  %v460_v19 = vsub.f32 %v457_v52, %v2055_v54  ;;  %v490_v54 = vsub.f32 %v486_v43, %v2082_v27  ;;  %v488_v43 = vsub.f32 %v480_v20, %v2078_v23 }
  0x9b   : > { %3087 = vst [vmem:[#allocation57_spill] sm:$0xff] %v2202_v51  ;;  %v450_v17 = vpop.permute.xlu0 %449 }
  0x9c   : > { %v464_v48 = vsel %vm78_vm2, 0.0, %v460_v19  ;;  %v467_v38 = vsub.f32 %v459_v28, %v2088_v16  ;;  %v454_v39 = vpop.permute.xlu1 %453  ;;  %v2225_v19 = vmul.f32 %v2197_v22, %v2197_v22  ;;  %v518_v7 = vmul.f32 %v490_v54, %v3052_v10 }
  0x9d   : > { %v468_v35 = vsub.f32 %v464_v48, %v2098_v29  ;;  %v456_v18 = vsel %vm203_vm5, %v450_v17, %v454_v39  ;;  %v458_v53 = vsel %vm203_vm5, %v454_v39, %v450_v17  ;;  %v2229_v48 = vmul.f32 %v2202_v51, %v2202_v51 }
  0x9e   : > { %v491_v42 = vmul.f32 %v467_v38, %v3056_v5  ;;  %v507_v40 = vmul.f32 %v467_v38, %v3045_v61  ;;  %v461_v52 = vsub.f32 %v456_v18, %v2061_v33  ;;  %v462_v28 = vsub.f32 %v458_v53, %v2063_v34 }
  0x9f   : > { %v492_v46 = vmul.f32 %v468_v35, %v3055_v8  ;;  %v508_v53 = vmul.f32 %v468_v35, %v3044_v62  ;;  %v502_v51 = vmul.f32 %v490_v54, %v3046_v60  ;;  %v500_v35 = vmul.f32 %v488_v43, %v3048_v58 }
  0xa0   : > { %v495_v17 = vadd.f32 %v1516_v41, %v491_v42  ;;  %v511_v38 = vadd.f32 %v1500_v11, %v507_v40  ;;  %v466_v33 = vsel %vm78_vm2, 0.0, %v462_v28  ;;  %v469_v34 = vsub.f32 %v461_v52, %v2091_v30  ;;  %v266_v39 = vpop.permute.xlu0 %265  ;;  %v268_v18 = vpop.permute.xlu1 %267 }
  0xa1   : > { %v470_v22 = vsub.f32 %v466_v33, %v2101_v15  ;;  %v496_v40 = vadd.f32 %v1512_v32, %v492_v46  ;;  %v516_v28 = vmul.f32 %v488_v43, %v3057_v2  ;;  %v512_v32 = vadd.f32 %v1496_v49, %v508_v53 }
  0xa2   : > { %v493_v20 = vmul.f32 %v469_v34, %v3051_v50  ;;  %v509_v41 = vmul.f32 %v469_v34, %v3043_v63  ;;  %v2243_v11 = vadd.f32 %v499_v47, %v495_v17  ;;  %v2245_v42 = vadd.f32 %v515_v55, %v511_v38 }
  0xa3   : > { %v494_v52 = vmul.f32 %v470_v22, %v3050_v56  ;;  %v510_v46 = vmul.f32 %v470_v22, %v3054_v0 }
  0xa4   : > { %v497_v33 = vadd.f32 %v1508_v12, %v493_v20  ;;  %v513_v54 = vadd.f32 %v1492_v14, %v509_v41  ;;  %v270_v26 = vpop.permute.xlu0 %269  ;;  %v272_v13 = vpop.permute.xlu1 %271  ;;  %v523_v47 = vmul.f32 %v2243_v11, %v2243_v11  ;;  %v527_v55 = vmul.f32 %v2245_v42, %v2245_v42  ;;  %v3088_v41 = vld [vmem:[#allocation39_spill] sm:$0xff] }
  0xa5   : > { %v273_v17 = vsel %vm203_vm5, %v266_v39, %v270_v26  ;;  %v275_v12 = vsel %vm203_vm5, %v270_v26, %v266_v39  ;;  %v274_v38 = vsel %vm203_vm5, %v268_v18, %v272_v13  ;;  %v276_v34 = vsel %vm203_vm5, %v272_v13, %v268_v18 }
  0xa6   : > { %v277_v14 = vsub.f32 %v273_v17, %v2068_v25  ;;  %v278_v43 = vsub.f32 %v275_v12, %v2078_v23  ;;  %v279_v49 = vsub.f32 %v274_v38, %v2072_v44  ;;  %v280_v22 = vsub.f32 %v276_v34, %v2082_v27 }
  0xa7   : > { %v2271_v53 = vadd.f32 %v501_v31, %v497_v33  ;;  %v2273_v20 = vadd.f32 %v517_v24, %v513_v54  ;;  %v498_v26 = vadd.f32 %v3088_v41, %v494_v52  ;;  %v3089_v23 = vsub.f32 %v2126_v45, %v2088_v16  ;;  %v3091_v24 = vld [vmem:[#allocation52_spill] sm:$0xff]  ;;  %v3092_v54 = vld [vmem:[#allocation53_spill] sm:$0xff] }
  0xa8   : > { %v282_v25 = vsel %vm78_vm2, 0.0, %v278_v43  ;;  %v196_v17 = vpop.permute.xlu0 %195  ;;  %v198_v12 = vpop.permute.xlu1 %197  ;;  %v531_v13 = vadd.f32 %v527_v55, %v523_v47  ;;  %v3090_v44 = vsub.f32 %v2134_v37, %v2098_v29  ;;  %v284_v31 = vsel %vm78_vm2, 0.0, %v280_v22  ;;  %v3093_v47 = vld [vmem:[#allocation38_spill] sm:$0xff]  ;;  %v3094_v41 = vld [vmem:[#allocation33_spill] sm:$0xff] }
  0xa9   : > { %v285_v39 = vadd.f32 %v277_v14, %v3089_v23  ;;  %v287_v18 = vadd.f32 %v279_v49, %v3091_v24  ;;  %v525_v52 = vmul.f32 %v2271_v53, %v2271_v53  ;;  %v288_v43 = vadd.f32 %v284_v31, %v3092_v54  ;;  %v3096_v24 = vld [vmem:[#allocation31_spill] sm:$0xff] }
  0xaa   : > { %v286_v27 = vadd.f32 %v282_v25, %v3090_v44  ;;  %v529_v45 = vmul.f32 %v2273_v20, %v2273_v20  ;;  %v535_v14 = vadd.f32 1e-20, %v531_v13  ;;  %v514_v55 = vadd.f32 %v3093_v47, %v510_v46  ;;  %v3095_v44 = vld [vmem:[#allocation32_spill] sm:$0xff] }
  0xab   : > { %v289_v33 = vmul.f32 0.14433756, %v285_v39  ;;  %v291_v37 = vmul.f32 0.14433756, %v287_v18  ;;  %v2293_v34 = vadd.f32 %v500_v35, %v496_v40  ;;  %v292_v49 = vmul.f32 0.14433756, %v288_v43 }
  0xac   : > { %v290_v38 = vmul.f32 0.14433756, %v286_v27  ;;  %v200_v25 = vpop.permute.xlu0 %199  ;;  %v202_v23 = vpop.permute.xlu1 %201  ;;  %1194 = vrsqrt.f32 %v535_v14  ;;  %v2298_v39 = vadd.f32 %v502_v51, %v498_v26  ;;  %v533_v51 = vadd.f32 %v529_v45, %v525_v52  ;;  %v3097_v14 = vld [vmem:[#allocation30_spill] sm:$0xff] }
  0xad   : > { %v2296_v22 = vadd.f32 %v3094_v41, %v289_v33  ;;  %v2304_v13 = vadd.f32 %v3096_v24, %v291_v37  ;;  %v204_v46 = vsel %vm203_vm5, %v196_v17, %v200_v25  ;;  %v206_v40 = vsel %vm203_vm5, %v200_v25, %v196_v17  ;;  %v3099_v41 = vld [vmem:[#allocation36_spill] sm:$0xff] }
  0xae   : > { %v2301_v31 = vadd.f32 %v3095_v44, %v290_v38  ;;  %v208_v27 = vsub.f32 %v204_v46, %v2088_v16  ;;  %v209_v18 = vsub.f32 %v206_v40, %v2098_v29  ;;  %v205_v26 = vsel %vm203_vm5, %v198_v12, %v202_v23 }
  0xaf   : > { %v309_v35 = vmul.f32 2.0, %v2296_v22  ;;  %v207_v33 = vsel %vm203_vm5, %v202_v23, %v198_v12  ;;  %v2317_v54 = vadd.f32 %v518_v7, %v514_v55  ;;  %v2319_v43 = vadd.f32 %v516_v28, %v512_v32  ;;  %v3098_v32 = vld [vmem:[#allocation37_spill] sm:$0xff] }
  0xb0   : > { %v2322_v47 = vadd.f32 %v3097_v14, %v292_v49  ;;  %v213_v17 = vsel %vm78_vm2, 0.0, %v209_v18  ;;  %v216_v16 = vmul.f32 0.28867513, %v208_v27  ;;  %v526_v29 = vmul.f32 %v2298_v39, %v2298_v39 }
  0xb1   : > { %v310_v52 = vmul.f32 2.0, %v2301_v31  ;;  %v311_v45 = vmul.f32 2.0, %v2304_v13  ;;  %v217_v38 = vmul.f32 0.28867513, %v213_v17  ;;  %v210_v7 = vsub.f32 %v205_v26, %v2091_v30 }
  0xb2   : > { %v313_v28 = vmul.f32 %v309_v35, %v2296_v22  ;;  %v2333_v12 = vadd.f32 %v3098_v32, %v216_v16  ;;  %v211_v55 = vsub.f32 %v207_v33, %v2101_v15  ;;  %v537_v37 = vadd.f32 1e-20, %v533_v51  ;;  %v3100_v35 = vld [vmem:[#allocation35_spill] sm:$0xff]  ;;  %v3101_v16 = vld [vmem:[#allocation34_spill] sm:$0xff] }
  0xb3   : > { %v2337_v49 = vadd.f32 %v3099_v41, %v217_v38  ;;  %v218_v25 = vmul.f32 0.28867513, %v210_v7  ;;  %v530_v23 = vmul.f32 %v2317_v54, %v2317_v54  ;;  %v524_v44 = vmul.f32 %v2293_v34, %v2293_v34 }
  0xb4   : > { %v297_v30 = vmul.f32 %v2333_v12, %v2333_v12  ;;  %v215_v24 = vsel %vm78_vm2, 0.0, %v211_v55  ;;  %1196 = vrsqrt.f32 %v537_v37  ;;  %v528_v15 = vmul.f32 %v2319_v43, %v2319_v43 }
  0xb5   : > { %v298_v46 = vmul.f32 %v2337_v49, %v2337_v49  ;;  %v219_v40 = vmul.f32 0.28867513, %v215_v24  ;;  %v2352_v27 = vadd.f32 %v3100_v35, %v218_v25  ;;  %v534_v18 = vadd.f32 %v530_v23, %v526_v29 }
  0xb6   : > { %v314_v51 = vmul.f32 %v310_v52, %v2301_v31  ;;  %v312_v26 = vmul.f32 2.0, %v2322_v47  ;;  %v305_v33 = vadd.f32 %v2188_v36, %v297_v30  ;;  %v532_v14 = vadd.f32 %v528_v15, %v524_v44 }
  0xb7   : > { %v306_v17 = vadd.f32 %v2192_v21, %v298_v46  ;;  %v2359_v38 = vadd.f32 %v3101_v16, %v219_v40  ;;  %v299_v7 = vmul.f32 %v2352_v27, %v2352_v27  ;;  %v538_v32 = vadd.f32 1e-20, %v534_v18 }
  0xb8   : > { %v315_v55 = vmul.f32 %v311_v45, %v2304_v13  ;;  %v317_v37 = vadd.f32 %v313_v28, %v305_v33  ;;  %v536_v29 = vadd.f32 1e-20, %v532_v14  ;;  %v316_v44 = vmul.f32 %v312_v26, %v2322_v47 }
  0xb9   : > { %v1195_v41 = vpop.eup %1194  ;;  %v318_v52 = vadd.f32 %v314_v51, %v306_v17  ;;  %v300_v25 = vmul.f32 %v2359_v38, %v2359_v38  ;;  %v307_v36 = vadd.f32 %v2225_v19, %v299_v7  ;;  %1198 = vrsqrt.f32 %v538_v32 }
  0xba   : > { %v321_v21 = vadd.f32 1e-20, %v317_v37  ;;  %v543_v23 = vmin.f32 %v1195_v41, 1.0  ;;  %1200 = vrsqrt.f32 %v536_v29 }
  0xbb   : > { %v322_v30 = vadd.f32 1e-20, %v318_v52  ;;  %v308_v24 = vadd.f32 %v2229_v48, %v300_v25  ;;  %v319_v15 = vadd.f32 %v315_v55, %v307_v36 }
  0xbc   : > { %1202 = vrsqrt.f32 %v321_v21  ;;  %v2370_v41 = vmul.f32 %v543_v23, %v2243_v11   ;;  %v2373_v11 = vmul.f32 %v543_v23, %v2245_v42  }
  0xbd   : > { %v320_v45 = vadd.f32 %v316_v44, %v308_v24  ;;  %v323_v28 = vadd.f32 1e-20, %v319_v15  ;;  %1204 = vrsqrt.f32 %v322_v30 }
  0xbe   : > { %3102 = vst [vmem:[#allocation58_spill] sm:$0xff] %v2370_v41  ;;  %3103 = vst [vmem:[#allocation59_spill] sm:$0xff] %v2373_v11  ;;  %v567_v19 = vmul.f32 %v2370_v41, %v3049_v57  ;;  %v571_v46 = vmul.f32 %v2373_v11, %v3058_v1  ;;  %v555_v24 = vmul.f32 %v2370_v41, %v3056_v5  ;;  %v3116_v5 = vld [vmem:[#allocation56_spill] sm:$0xff] }
  0xbf   : > { %v324_v40 = vadd.f32 1e-20, %v320_v45  ;;  %1206 = vrsqrt.f32 %v323_v28 }
  0xc0   : > { %v2379_v48 = vadd.f32 %v571_v46, %v567_v19  ;;  %v559_v19 = vmul.f32 %v2373_v11, %v3045_v61 }
  0xc1   : > { %v1197_v35 = vpop.eup %1196  ;;  %1208 = vrsqrt.f32 %v324_v40 }
  0xc2   : > { %v545_v18 = vmin.f32 %v1197_v35, 1.0 }
  0xc4   : > { %v2382_v51 = vmul.f32 %v545_v18, %v2271_v53   ;;  %v2385_v14 = vmul.f32 %v545_v18, %v2273_v20  }
  0xc6   : > { %3104 = vst [vmem:[#allocation60_spill] sm:$0xff] %v2382_v51  ;;  %v1199_v42 = vpop.eup %1198  ;;  %v569_v26 = vmul.f32 %v2382_v51, %v3047_v59  ;;  %v573_v33 = vmul.f32 %v2385_v14, %v3053_v9 }
  0xc7   : > { %v1201_v17 = vpop.eup %1200  ;;  %v546_v16 = vmin.f32 %v1199_v42, 1.0  ;;  %v2433_v42 = vadd.f32 %v559_v19, %v555_v24  ;;  %v3114_v19 = vld [vmem:[#allocation55_spill] sm:$0xff] }
  0xc8   : > { %v2391_v7 = vadd.f32 %v573_v33, %v569_v26  ;;  %v544_v32 = vmin.f32 %v1201_v17, 1.0  ;;  %v561_v17 = vmul.f32 %v2385_v14, %v3043_v63 }
  0xc9   : > { %v1203_v55 = vpop.eup %1202  ;;  %v2394_v37 = vmul.f32 %v546_v16, %v2298_v39   ;;  %v2397_v53 = vmul.f32 %v546_v16, %v2317_v54  }
  0xca   : > { %v1205_v20 = vpop.eup %1204  ;;  %v329_v29 = vmul.f32 2.0, %v1203_v55  ;;  %v2400_v52 = vmul.f32 %v544_v32, %v2293_v34   ;;  %v2407_v39 = vmul.f32 %v544_v32, %v2319_v43   ;;  %v609_v32 = vrot.slane %v2391_v7, 7 }
  0xcb   : > { %3105 = vst [vmem:[#allocation61_spill] sm:$0xff] %v2394_v37  ;;  %v330_v25 = vmul.f32 2.0, %v1205_v20  ;;  %v570_v36 = vmul.f32 %v2394_v37, %v3046_v60  ;;  %v574_v44 = vmul.f32 %v2397_v53, %v3052_v10 }
  0xcc   : > { %3106 = vst [vmem:[#allocation62_spill] sm:$0xff] %v2400_v52  ;;  %v1207_v21 = vpop.eup %1206  ;;  %v333_v23 = vmin.f32 %v329_v29, 1.0  ;;  %v3107_v45 = vmov %v2407_v39  ;;  %v568_v40 = vmul.f32 %v2400_v52, %v3048_v58  ;;  %v556_v29 = vmul.f32 %v2400_v52, %v3055_v8 }
  0xcd   : > { %v331_v30 = vmul.f32 2.0, %v1207_v21  ;;  %v334_v54 = vmin.f32 %v330_v25, 1.0  ;;  %v2416_v46 = vadd.f32 %v574_v44, %v570_v36  ;;  %v572_v18 = vmul.f32 %v3107_v45, %v3057_v2  ;;  %v3110_v21 = vld [vmem:[#allocation54_spill] sm:$0xff] }
  0xce   : > { %v1209_v15 = vpop.eup %1208  ;;  %v2412_v34 = vmul.f32 %v333_v23, %v2333_v12   ;;  %v560_v25 = vmul.f32 %v3107_v45, %v3044_v62  ;;  %v2463_v39 = vmul.f32 %v333_v23, %v3110_v21  }
  0xcf   : > { %v335_v35 = vmin.f32 %v331_v30, 1.0  ;;  %v332_v43 = vmul.f32 2.0, %v1209_v15  ;;  %v2425_v33 = vmul.f32 %v334_v54, %v2301_v31   ;;  %v2435_v26 = vadd.f32 %v572_v18, %v568_v40 }
  0xd0   : > { %v3108_v28 = vmov %v2412_v34  ;;  %v2431_v34 = vmul.f32 %v333_v23, %v2296_v22   ;;  %v557_v31 = vmul.f32 %v2382_v51, %v3051_v50  ;;  %v607_v22 = vrot.slane %v2379_v48, 7  ;;  %v3119_v51 = vld [vmem:[#allocation47_spill] sm:$0xff] }
  0xd1   : > { %349 = vrot.lane.b32.xlu0 %v3108_v28, %s1571_s20  ;;  %v2428_v44 = vmul.f32 %v335_v35, %v2352_v27   ;;  %v336_v12 = vmin.f32 %v332_v43, 1.0  ;;  %v375_v27 = vrot.slane %v2425_v33, 7  ;;  %v608_v16 = vrot.slane %v2435_v26, 7 }
  0xd2   : > { %v610_v55 = vrot.slane %v2416_v46, 7  ;;  %v2455_v20 = vmul.f32 %v335_v35, %v2304_v13   ;;  %v3111_v43 = vmov %v2463_v39  ;;  %v2466_v24 = vmul.f32 %v334_v54, %v2337_v49  }
  0xd3   : > { %351 = vrot.lane.b32.xlu1 %v2428_v44, %s1571_s20  ;;  %v2443_v30 = vmul.f32 %v336_v12, %v2322_v47   ;;  %v2470_v15 = vsel %vm378_vm6, %v607_v22, %v609_v32  ;;  %v2479_v40 = vmul.f32 %v334_v54, %v3114_v19   ;;  %v2503_v39 = vsel %vm82_vm3, 0.0, %v2391_v7 }
  0xd4   : > { %v3109_v47 = vmov %v2455_v20  ;;  %3112 = vst [vmem:[#allocation63_spill] sm:$0xff] %v2466_v24  ;;  %v3113_v1 = vmov %v2466_v24  ;;  %v2474_v13 = vsel %vm378_vm6, %v608_v16, %v610_v55  ;;  %v2508_v24 = vsel %vm82_vm3, 0.0, %v2416_v46 }
  0xd5   : > { %399 = vrot.lane.b32.xlu0 %v2431_v34, %s1571_s20  ;;  %v377_v36 = vrot.slane %v2443_v30, 7  ;;  %v2484_v18 = vsel %vm82_vm3, 0.0, %v2443_v30  ;;  %v613_v21 = vsel %vm378_vm6, %v609_v32, %v607_v22  ;;  %v614_v2 = vsel %vm378_vm6, %v610_v55, %v608_v16 }
  0xd6   : > { %v2524_v8 = vmul.f32 %v335_v35, %v3116_v5   ;;  %v2537_v19 = vsel %vm83_vm1, 0.0, %v614_v2  ;;  %v423_v22 = vrot.slane %v3111_v43, 7  ;;  %v2548_v55 = vadd.f32 %v561_v17, %v557_v31 }
  0xd7   : > { %401 = vrot.lane.b32.xlu1 %v3109_v47, %s1571_s20  ;;  %v2488_v49 = vsel %vm378_vm6, %v375_v27, %v377_v36  ;;  %v382_v20 = vsel %vm378_vm6, %v377_v36, %v375_v27  ;;  %v2511_v27 = vmul.f32 %v336_v12, %v2359_v38   ;;  %v3117_v38 = vld [vmem:[#allocation57_spill] sm:$0xff]  ;;  %v558_v2 = vmul.f32 %v2394_v37, %v3050_v56 }
  0xd8   : > { %v2498_v54 = vsel %vm83_vm1, 0.0, %v382_v20  ;;  %v2527_v35 = vmul.f32 %v336_v12, %v3117_v38   ;;  %v425_v16 = vrot.slane %v2524_v8, 7  ;;  %v564_v38 = vadd.f32 %v560_v25, %v556_v29 }
  0xd9   : > { %353 = vrot.lane.b32.xlu0 %v3113_v1, %s1571_s20  ;;  %v392_v36 = vsub.f32 %v2425_v33, %v2498_v54  ;;  %v2533_v54 = vsel %vm83_vm1, 0.0, %v613_v21  ;;  %v562_v21 = vmul.f32 %v2397_v53, %v3054_v0  ;;  %v2561_v5 = vsel %vm82_vm3, 0.0, %v2524_v8 }
  0xda   : > { %v426_v32 = vrot.slane %v2527_v35, 7  ;;  %v2556_v20 = vsel %vm378_vm6, %v423_v22, %v425_v16  ;;  %v424_v12 = vrot.slane %v2479_v40, 7  ;;  %v429_v31 = vsel %vm378_vm6, %v425_v16, %v423_v22 }
  0xdb   : > { %355 = vrot.lane.b32.xlu1 %v2511_v27, %s1571_s20  ;;  %v2572_v29 = vsel %vm83_vm1, 0.0, %v429_v31  ;;  %v2578_v25 = vsel %vm82_vm3, 0.0, %v2527_v35  ;;  %v566_v0 = vadd.f32 %v562_v21, %v558_v2  ;;  %v376_v2 = vrot.slane %v3109_v47, 7 }
  0xdc   : > { %v2582_v22 = vsel %vm378_vm6, %v424_v12, %v426_v32  ;;  %v430_v16 = vsel %vm378_vm6, %v426_v32, %v424_v12  ;;  %v374_v32 = vrot.slane %v2431_v34, 7  ;;  %v367_v58 = vsel %vm78_vm2, 0.0, %v3113_v1 }
  0xdd   : > { %579 = vrot.lane.b32.xlu0 %v2433_v42, %s1571_s20  ;;  %v2592_v9 = vsel %vm83_vm1, 0.0, %v430_v16  ;;  %v639_v37 = vadd.f32 %v3119_v51, %v2433_v42 }
  0xde   : > { %v381_v16 = vsel %vm378_vm6, %v376_v2, %v374_v32  ;;  %v379_v61 = vsel %vm378_vm6, %v374_v32, %v376_v2 }
  0xdf   : > { %581 = vrot.lane.b32.xlu1 %v2548_v55, %s1571_s20  ;;  %v383_v31 = vsel %vm83_vm1, 0.0, %v381_v16 }
  0xe0   : > { %v391_v16 = vsub.f32 %v2431_v34, %v383_v31 }
  0xe1   : > { %583 = vrot.lane.b32.xlu0 %v564_v38, %s1571_s20 }
  0xe3   : > { %585 = vrot.lane.b32.xlu1 %v566_v0, %s1571_s20 }
  0xe5   : > { %403 = vrot.lane.b32.xlu0 %v2425_v33, %s1571_s20 }
  0xe7   : > { %405 = vrot.lane.b32.xlu1 %v2443_v30, %s1571_s20 }
 0x143   : > { %v350_v12 = vpop.permute.xlu0 %349 }
 0x145   : > { %v352_v21 = vpop.permute.xlu1 %351 }
 0x147   : > { %v2603_v17 = vpop.permute.xlu0 %399 }
 0x149   : > { %v2608_v10 = vpop.permute.xlu1 %401 }
 0x14b   : > { %v354_v50 = vpop.permute.xlu0 %353 }
 0x14c   : > { %v358_v56 = vsel %vm357_vm7, %v350_v12, %v354_v50  ;;  %v360_v57 = vsel %vm357_vm7, %v354_v50, %v350_v12  ;;  %v369_v12 = vsel %vm78_vm2, 0.0, %v2511_v27 }
 0x14d   : > { %v362_v59 = vsel %vm79_vm0, 0.0, %v360_v57  ;;  %v371_v60 = vsub.f32 %v367_v58, %v358_v56  ;;  %v356_v62 = vpop.permute.xlu1 %355  ;;  %v389_v58 = vsel %vm82_vm3, 0.0, %v3109_v47 }
 0x14e   : > { %v370_v63 = vsub.f32 %v3108_v28, %v362_v59  ;;  %v359_v41 = vsel %vm357_vm7, %v352_v21, %v356_v62  ;;  %v361_v50 = vsel %vm357_vm7, %v356_v62, %v352_v21  ;;  %v3118_v21 = vld [vmem:[#allocation46_spill] sm:$0xff]  ;;  %v393_v4 = vsub.f32 %v389_v58, %v379_v61 }
 0x14f   : > { %v396_v57 = vadd.f32 %v392_v36, %v371_v60  ;;  %v580_v56 = vpop.permute.xlu0 %579  ;;  %v364_v31 = vsel %vm79_vm0, 0.0, %v361_v50  ;;  %v373_v59 = vsub.f32 %v369_v12, %v359_v41  ;;  %v640_v2 = vadd.f32 %v3118_v21, %v564_v38 }
 0x150   : > { %v395_v32 = vadd.f32 %v391_v16, %v370_v63  ;;  %v372_v62 = vsub.f32 %v2428_v44, %v364_v31  ;;  %v3120_v60 = vsub.f32 %v2484_v18, %v2488_v49  ;;  %v3121_v18 = vld [vmem:[#allocation43_spill] sm:$0xff]  ;;  %v3122_v63 = vld [vmem:[#allocation44_spill] sm:$0xff]  ;;  %v596_v12 = vsel %vm78_vm2, 0.0, %v564_v38 }
 0x151   : > { %v644_v52 = vmul.f32 0.28867513, %v396_v57  ;;  %v582_v11 = vpop.permute.xlu1 %581  ;;  %v2646_v50 = vadd.f32 %v3121_v18, %v2379_v48  ;;  %v642_v41 = vadd.f32 %v3122_v63, %v566_v0  ;;  %v598_v38 = vsel %vm78_vm2, 0.0, %v566_v0 }
 0x152   : > { %v398_v36 = vadd.f32 %v3120_v60, %v373_v59  ;;  %v643_v23 = vmul.f32 0.28867513, %v395_v32  ;;  %v397_v16 = vadd.f32 %v393_v4, %v372_v62  ;;  %v3124_v59 = vld [vmem:[#allocation45_spill] sm:$0xff] }
 0x153   : > { %v2649_v61 = vadd.f32 %v644_v52, %v640_v2   ;;  %v584_v57 = vpop.permute.xlu0 %583  ;;  %v641_v32 = vadd.f32 %v3124_v59, %v2548_v55 }
 0x154   : > { %v646_v58 = vmul.f32 0.28867513, %v398_v36  ;;  %v2653_v37 = vadd.f32 %v643_v23, %v639_v37   ;;  %v587_v49 = vsel %vm357_vm7, %v580_v56, %v584_v57  ;;  %v589_v31 = vsel %vm357_vm7, %v584_v57, %v580_v56 }
 0x155   : > { %v645_v60 = vmul.f32 0.28867513, %v397_v16  ;;  %v591_v4 = vsel %vm79_vm0, 0.0, %v589_v31  ;;  %v600_v52 = vsub.f32 %v596_v12, %v587_v49  ;;  %v418_v56 = vsel %vm78_vm2, 0.0, %v2443_v30  ;;  %668 = vst [vmem:[%s2931_s10 + $0x8] sm:$0xff] (%p2751_p0), %v2649_v61 }
 0x156   : > { %3123 = vst [vmem:[#allocation64_spill] sm:$0xff] %v2653_v37  ;;  %v2663_v2 = vadd.f32 %v646_v58, %v642_v41   ;;  %v586_v37 = vpop.permute.xlu1 %585  ;;  %v599_v62 = vsub.f32 %v2433_v42, %v591_v4  ;;  %v3126_v41 = vld [vmem:[#allocation50_spill] sm:$0xff]  ;;  %v3127_v42 = vld [vmem:[#allocation51_spill] sm:$0xff]  ;;  %v3128_v4 = vsub.f32 %v2435_v26, %v2537_v19 }
 0x157   : > { %v2671_v36 = vadd.f32 %v645_v60, %v641_v32   ;;  %v588_v23 = vsel %vm357_vm7, %v582_v11, %v586_v37  ;;  %v590_v16 = vsel %vm357_vm7, %v586_v37, %v582_v11  ;;  %v604_v12 = vadd.f32 %v3126_v41, %v600_v52  ;;  %v404_v58 = vpop.permute.xlu0 %403 }
 0x158   : > { %v593_v0 = vsel %vm79_vm0, 0.0, %v590_v16  ;;  %v602_v49 = vsub.f32 %v598_v38, %v588_v23  ;;  %v603_v31 = vadd.f32 %v3127_v42, %v599_v62  ;;  %v407_v32 = vsel %vm357_vm7, %v2603_v17, %v404_v58  ;;  %v3129_v23 = vld [vmem:[#allocation48_spill] sm:$0xff]  ;;  %670 = vst [vmem:[%s2931_s10 + $0x18] sm:$0xff] (%p2751_p0), %v2663_v2 }
 0x159   : > { %v3125_v57 = vmov %v2671_v36  ;;  %v601_v60 = vsub.f32 %v2548_v55, %v593_v0  ;;  %v628_v36 = vadd.f32 %v3128_v4, %v604_v12  ;;  %v416_v11 = vsel %vm78_vm2, 0.0, %v2425_v33  ;;  %v3131_v12 = vld [vmem:[#allocation49_spill] sm:$0xff]  ;;  %v3132_v4 = vld [vmem:[#allocation9_spill] sm:$0xff] }
 0x15a   : > { %v409_v52 = vsel %vm357_vm7, %v404_v58, %v2603_v17  ;;  %v606_v38 = vadd.f32 %v3129_v23, %v602_v49  ;;  %v3130_v37 = vsub.f32 %v2379_v48, %v2533_v54  ;;  %v406_v16 = vpop.permute.xlu1 %405  ;;  %v420_v19 = vsub.f32 %v416_v11, %v407_v32  ;;  %v3134_v58 = vld [vmem:[#allocation8_spill] sm:$0xff]  ;;  %v3136_v11 = vld [vmem:[#allocation27_spill] sm:$0xff]  ;;  %669 = vst [vmem:[%s2931_s10 + $0x10] sm:$0xff] (%p2751_p0), %v3125_v57 }
 0x15b   : > { %v411_v55 = vsel %vm79_vm0, 0.0, %v409_v52  ;;  %v605_v0 = vadd.f32 %v3131_v12, %v601_v60  ;;  %v632_v6 = vadd.f32 %v628_v36, %v3132_v4  ;;  %v408_v1 = vsel %vm357_vm7, %v2608_v10, %v406_v16 }
 0x15c   : > { %v627_v62 = vadd.f32 %v3130_v37, %v603_v31  ;;  %v410_v17 = vsel %vm357_vm7, %v406_v16, %v2608_v10  ;;  %v3133_v48 = vsub.f32 %v2508_v24, %v2474_v13  ;;  %v422_v32 = vsub.f32 %v418_v56, %v408_v1  ;;  %v3138_v16 = vld [vmem:[#allocation12_spill] sm:$0xff]  ;;  %v3139_v24 = vld [vmem:[#allocation26_spill] sm:$0xff] }
 0x15d   : > { %v413_v31 = vsel %vm79_vm0, 0.0, %v410_v17  ;;  %v3135_v60 = vsub.f32 %v2503_v39, %v2470_v15  ;;  %v2718_v52 = vmul.f32 %v3136_v11, %v632_v6   ;;  %v419_v10 = vsub.f32 %v2431_v34, %v411_v55  ;;  %v3143_v56 = vld [vmem:[#allocation10_spill] sm:$0xff]  ;;  %v3166_v11 = vld [vmem:[#allocation59_spill] sm:$0xff] }
 0x15e   : > { %v630_v54 = vadd.f32 %v3133_v48, %v606_v38  ;;  %v631_v49 = vadd.f32 %v627_v62, %v3134_v58  ;;  %v421_v37 = vsub.f32 %v3109_v47, %v413_v31  ;;  %v3141_v17 = vsub.f32 %v2578_v25, %v2582_v22 }
 0x15f   : > { %v629_v36 = vadd.f32 %v3135_v60, %v605_v0  ;;  %3137 = vst [vmem:[#allocation65_spill] sm:$0xff] %v2718_v52  ;;  %v3142_v15 = vsub.f32 %v2479_v40, %v2592_v9  ;;  %v3145_v55 = vsub.f32 %v2561_v5, %v2556_v20  ;;  %v3153_v20 = vmov %v3124_v59 }
 0x160   : > { %v634_v13 = vadd.f32 %v630_v54, %v3138_v16  ;;  %v2724_v38 = vmul.f32 %v3139_v24, %v631_v49   ;;  %v446_v1 = vadd.f32 %v3141_v17, %v422_v32  ;;  %v3146_v54 = vsub.f32 %v3111_v43, %v2572_v29  ;;  %v3147_v49 = vld [vmem:[#allocation29_spill] sm:$0xff]  ;;  %v3148_v17 = vld [vmem:[#allocation42_spill] sm:$0xff]  ;;  %v3150_v16 = vld [vmem:[#allocation41_spill] sm:$0xff] }
 0x161   : > { %v444_v39 = vadd.f32 %v3142_v15, %v420_v19  ;;  %v633_v6 = vadd.f32 %v629_v36, %v3143_v56  ;;  %v3144_v15 = vld [vmem:[#allocation40_spill] sm:$0xff]  ;;  %v445_v48 = vadd.f32 %v3145_v55, %v421_v37  ;;  %v652_v9 = vadd.f32 %v3148_v17, %v2435_v26  ;;  %v3149_v19 = vld [vmem:[#allocation28_spill] sm:$0xff] }
 0x162   : > { %3140 = vst [vmem:[#allocation66_spill] sm:$0xff] %v2724_v38  ;;  %v654_v0 = vadd.f32 %v3144_v15, %v2416_v46  ;;  %v443_v58 = vadd.f32 %v3146_v54, %v419_v10  ;;  %v638_v60 = vmul.f32 %v3147_v49, %v634_v13   ;;  %v658_v25 = vmul.f32 0.28867513, %v446_v1  ;;  %v3167_v55 = vld [vmem:[#allocation61_spill] sm:$0xff]  ;;  %v3178_v37 = vld [vmem:[#allocation64_spill] sm:$0xff] }
 0x163   : > { %v656_v22 = vmul.f32 0.28867513, %v444_v39  ;;  %v637_v56 = vmul.f32 %v3149_v19, %v633_v6   ;;  %v653_v46 = vadd.f32 %v3150_v16, %v2391_v7  ;;  %v657_v31 = vmul.f32 0.28867513, %v445_v48  ;;  %v3162_v48 = vld [vmem:[#allocation63_spill] sm:$0xff] }
 0x164   : > { %v655_v32 = vmul.f32 0.28867513, %v443_v58  ;;  %v662_v5 = vadd.f32 %v658_v25, %v654_v0   ;;  %v3152_v19 = vmov %v3122_v63  ;;  %v3155_v24 = vmov %v3131_v12  ;;  %v3168_v12 = vld [vmem:[#allocation60_spill] sm:$0xff]  ;;  %666 = vst [vmem:[%s2930_s9 + $0x18] sm:$0xff] (%p2751_p0), %v638_v60 }
 0x165   : > { %v660_v3 = vadd.f32 %v656_v22, %v652_v9   ;;  %v661_v62 = vadd.f32 %v657_v31, %v653_v46   ;;  %v3154_v22 = vmov %v3119_v51  ;;  %v3156_v25 = vmov %v3126_v41  ;;  %v3170_v41 = vld [vmem:[#allocation58_spill] sm:$0xff]  ;;  %665 = vst [vmem:[%s2930_s9 + $0x10] sm:$0xff] (%p2751_p0), %v637_v56 }
 0x166   : > { %v659_v4 = vadd.f32 %v655_v32, %v2646_v50   ;;  %v3157_v26 = vmov %v3127_v42  ;;  %v3158_v31 = vmov %v3109_v47  ;;  %v3159_v39 = vmov %v2524_v8  ;;  %v3169_v32 = vld [vmem:[#allocation62_spill] sm:$0xff]  ;;  %125 = sbr.rel (!%p2751_p0) target bundleno = 29 (0x1d), region = 79  ;;  %v3185_v7 = vld [vmem:[#allocation65_spill] sm:$0xff] (%p2751_p0)  ;;  %674 = vst [vmem:[%s2932_s11 + $0x18] sm:$0xff] (%p2751_p0), %v662_v5 }
 0x167   : > { %v3160_v42 = vmov %v3111_v43  ;;  %v3161_v43 = vmov %v2511_v27  ;;  %v3163_v54 = vmov %v3108_v28  ;;  %v3164_v13 = vmov %v2397_v53  ;;  %v3181_v28 = vld [vmem:[#allocation65_spill] sm:$0xff]  ;;  %664 = vst [vmem:[%s2930_s9 + $0x8] sm:$0xff] (%p2751_p0), %v3185_v7  ;;  %672 = vst [vmem:[%s2932_s11 + $0x8] sm:$0xff] (%p2751_p0), %v660_v3 }
 0x168   : > { %v3165_v49 = vmov %v3107_v45  ;;  %v3171_v53 = vmov %v662_v5  ;;  %v3172_v52 = vmov %v661_v62  ;;  %v3173_v51 = vmov %v660_v3  ;;  %671 = vst [vmem:[%s2932_s11] sm:$0xff] (%p2751_p0), %v659_v4  ;;  %673 = vst [vmem:[%s2932_s11 + $0x10] sm:$0xff] (%p2751_p0), %v661_v62 }
 0x169   : > { %v3174_v47 = vmov %v659_v4  ;;  %v3175_v46 = vmov %v2663_v2  ;;  %v3176_v45 = vmov %v3125_v57  ;;  %v3177_v38 = vmov %v2649_v61  ;;  %v3182_v27 = vld [vmem:[#allocation66_spill] sm:$0xff] }
 0x16a   : > { %v3179_v36 = vmov %v638_v60  ;;  %v3180_v29 = vmov %v637_v56  ;;  %v3184_v8 = vld [vmem:[#allocation66_spill] sm:$0xff] (%p2751_p0)  ;;  %v3186_v27 = vld [vmem:[#allocation64_spill] sm:$0xff] (%p2751_p0) }
 0x16b   :  { %663 = vst [vmem:[%s2930_s9] sm:$0xff] %v3184_v8  ;;  %667 = vst [vmem:[%s2931_s10] sm:$0xff] %v3186_v27 }

</bundles_post_ra>
